<compile_context>
chip_gen: v6e
topology: v6e:2x2x1
jax: 0.10.0
libtpu: 0.0.40
codegen_flags: <defaults>
</compile_context>

<pallas_src>
import functools

import jax
import jax.numpy as jnp
from jax import lax
from jax.experimental import pallas as pl
from jax.experimental.pallas import tpu as pltpu

_EPS = 1e-5


def _round_up(v, m):
    return ((v + m - 1) // m) * m


def _pad_rows(W):
    # Zero rows above/below the flattened (row-major, width-padded) image.
    # Must be >= W + 3 so every 3x3 tap window stays in bounds; rounded to a
    # multiple of 16 so in-kernel bf16 concatenation stays tile-aligned.
    return _round_up(W + 3, 16)


# ----------------------------------------------------------------------------
# In-kernel helpers
# ----------------------------------------------------------------------------
def _accumulate_taps(xp, w, *, H, W, Cout):
    """Fused 9-tap 3x3 convolution on a flat padded image.

    xp: (H*(W+2) + 2*T, Cin) bf16 -- row-major image, width-padded by one zero
        column on each side, with T zero rows above and below (T = _pad_rows).
    w:  (9, Cin, Cout) bf16, tap-major (di*3 + dj).
    Returns an (H*(W+2), Cout) f32 accumulator.  The two edge columns of every
    image row are garbage (they mix row ends) and are masked by the callers.
    """
    Wp = W + 2
    Q = H * Wp
    T = _pad_rows(W)
    acc = jnp.zeros((Q, Cout), jnp.float32)
    for di in range(3):
        for dj in range(3):
            start = T + (di - 1) * Wp + (dj - 1)
            tap = xp[start:start + Q, :]
            acc = acc + jnp.dot(tap, w[di * 3 + dj],
                                preferred_element_type=jnp.float32)
    return acc


def _emit_stats(acc, mask, stats_ref):
    """Per-channel sum / sum-of-squares of the valid conv outputs."""
    macc = acc * mask
    s0 = jnp.sum(macc, axis=0, keepdims=True)
    s1 = jnp.sum(macc * acc, axis=0, keepdims=True)
    stats_ref[...] = jnp.concatenate([s0, s1], axis=0)


# ----------------------------------------------------------------------------
# Kernel 1: conv3x3 + fused BN statistics (input already padded, bf16)
# ----------------------------------------------------------------------------
def _conv_stats_kernel(xp_ref, w_ref, mask_ref, y_ref, stats_ref, *, H, W, Cout):
    acc = _accumulate_taps(xp_ref[...], w_ref[...], H=H, W=W, Cout=Cout)
    y_ref[...] = acc
    _emit_stats(acc, mask_ref[...], stats_ref)


# TODO(synk): for very large images (per-image block > VMEM budget) or N == 1,
# split H into halo'd row tiles so the grid keeps >= 2 parallel blocks.
def _conv_stats_call(xp, w9, mask, *, H, W, Cout):
    N, P, Cin = xp.shape
    Q = H * (W + 2)
    kern = functools.partial(_conv_stats_kernel, H=H, W=W, Cout=Cout)
    return pl.pallas_call(
        kern,
        out_shape=(jax.ShapeDtypeStruct((N, Q, Cout), jnp.float32),
                   jax.ShapeDtypeStruct((N, 2, Cout), jnp.float32)),
        grid=(N,),
        in_specs=[pl.BlockSpec((None, P, Cin), lambda n: (n, 0, 0)),
                  pl.BlockSpec((9, Cin, Cout), lambda n: (0, 0, 0)),
                  pl.BlockSpec((Q, 1), lambda n: (0, 0))],
        out_specs=(pl.BlockSpec((None, Q, Cout), lambda n: (n, 0, 0)),
                   pl.BlockSpec((None, 2, Cout), lambda n: (n, 0, 0))),
        compiler_params=pltpu.CompilerParams(
            dimension_semantics=("parallel",)),
    )(xp, w9, mask)


# ----------------------------------------------------------------------------
# Kernel 2: fused BN1-apply + ReLU + re-pad + conv3x3 + BN2 statistics
# ----------------------------------------------------------------------------
def _bn_conv_stats_kernel(y_ref, scale_ref, shift_ref, w_ref, mask_ref,
                          out_ref, stats_ref, *, H, W, Cout):
    T = _pad_rows(W)
    Cin = y_ref.shape[-1]
    mask = mask_ref[...]
    # BN1 apply + ReLU.  The masked edge columns double as the W-padding of
    # this conv's input; T zero rows provide the H-padding.
    z = jnp.maximum(y_ref[...] * scale_ref[...] + shift_ref[...], 0.0) * mask
    zb = z.astype(jnp.bfloat16)
    zpad = jnp.zeros((T, Cin), jnp.bfloat16)
    xp = jnp.concatenate([zpad, zb, zpad], axis=0)
    acc = _accumulate_taps(xp, w_ref[...], H=H, W=W, Cout=Cout)
    out_ref[...] = acc
    _emit_stats(acc, mask, stats_ref)


def _bn_conv_stats_call(y_prev, scale, shift, w9, mask, *, H, W, Cout):
    N, Q, Cin = y_prev.shape
    kern = functools.partial(_bn_conv_stats_kernel, H=H, W=W, Cout=Cout)
    return pl.pallas_call(
        kern,
        out_shape=(jax.ShapeDtypeStruct((N, Q, Cout), jnp.float32),
                   jax.ShapeDtypeStruct((N, 2, Cout), jnp.float32)),
        grid=(N,),
        in_specs=[pl.BlockSpec((None, Q, Cin), lambda n: (n, 0, 0)),
                  pl.BlockSpec((1, Cin), lambda n: (0, 0)),
                  pl.BlockSpec((1, Cin), lambda n: (0, 0)),
                  pl.BlockSpec((9, Cin, Cout), lambda n: (0, 0, 0)),
                  pl.BlockSpec((Q, 1), lambda n: (0, 0))],
        out_specs=(pl.BlockSpec((None, Q, Cout), lambda n: (n, 0, 0)),
                   pl.BlockSpec((None, 2, Cout), lambda n: (n, 0, 0))),
        compiler_params=pltpu.CompilerParams(
            dimension_semantics=("parallel",)),
    )(y_prev, scale, shift, w9, mask)


# ----------------------------------------------------------------------------
# Kernel 3: final BN2-apply + ReLU (lane-dense streaming pass)
# ----------------------------------------------------------------------------
def _bn_relu_kernel(y_ref, scale_ref, shift_ref, o_ref):
    o_ref[...] = jnp.maximum(y_ref[...] * scale_ref[...] + shift_ref[...], 0.0)


def _bn_relu_call(y2d, scale_row, shift_row):
    R, L = y2d.shape
    tr = min(_round_up(R, 8), 2048)          # large streaming row tiles
    Rp = _round_up(R, tr)
    y_p = y2d if Rp == R else jnp.pad(y2d, ((0, Rp - R), (0, 0)))
    out = pl.pallas_call(
        _bn_relu_kernel,
        out_shape=jax.ShapeDtypeStruct((Rp, L), jnp.float32),
        grid=(Rp // tr,),
        in_specs=[pl.BlockSpec((tr, L), lambda i: (i, 0)),
                  pl.BlockSpec((1, L), lambda i: (0, 0)),
                  pl.BlockSpec((1, L), lambda i: (0, 0))],
        out_specs=pl.BlockSpec((tr, L), lambda i: (i, 0)),
        compiler_params=pltpu.CompilerParams(
            dimension_semantics=("parallel",)),
    )(y_p, scale_row, shift_row)
    return out if Rp == R else out[:R]


# ----------------------------------------------------------------------------
# JAX-side glue
# ----------------------------------------------------------------------------
def _bn_scale_shift(stats, gamma, beta, count):
    s = jnp.sum(stats, axis=0)                 # (2, C), summed over images
    mean = s[0] / count
    var = s[1] / count - mean * mean           # biased variance (torch training)
    scale = gamma * lax.rsqrt(var + _EPS)
    shift = beta - mean * scale
    return scale.reshape(1, -1), shift.reshape(1, -1)


def _maxpool2(x):  # NHWC, nn.MaxPool2d(2)
    N, H, W, C = x.shape
    return x.reshape(N, H // 2, 2, W // 2, 2, C).max(axis=(2, 4))


@jax.jit
def down_forward(params, x_nchw):
    # TODO(synk): fuse the NCHW->NHWC transpose and the 2x2 maxpool into the
    # first conv kernel's prologue to save one more HBM pass of the input.
    x = jnp.transpose(x_nchw, (0, 2, 3, 1))    # NCHW -> NHWC
    x = _maxpool2(x)
    N, H, W, Cin = x.shape
    Wp = W + 2
    Q = H * Wp
    T = _pad_rows(W)

    # One bf16 pad pass builds the flat, spatially padded conv1 input.
    xw = jnp.pad(x.astype(jnp.bfloat16),
                 ((0, 0), (0, 0), (1, 1), (0, 0))).reshape(N, Q, Cin)
    xp1 = jnp.pad(xw, ((0, 0), (T, T), (0, 0)))

    # Valid-column mask (edge columns of each flattened row are padding).
    col = jnp.arange(Q, dtype=jnp.int32) % Wp
    mask = ((col >= 1) & (col <= W)).astype(jnp.float32).reshape(Q, 1)

    # NOTE: conv biases are intentionally dropped -- a per-channel constant
    # added before training-mode BatchNorm cancels exactly after normalization.
    w1 = params["conv1"]["w"]
    Cmid = w1.shape[-1]
    w1_9 = w1.reshape(9, Cin, Cmid).astype(jnp.bfloat16)
    y1, st1 = _conv_stats_call(xp1, w1_9, mask, H=H, W=W, Cout=Cmid)

    count = N * H * W
    scale1, shift1 = _bn_scale_shift(st1, params["bn1"]["gamma"],
                                     params["bn1"]["beta"], count)

    w2 = params["conv2"]["w"]
    Cout = w2.shape[-1]
    w2_9 = w2.reshape(9, Cmid, Cout).astype(jnp.bfloat16)
    y2, st2 = _bn_conv_stats_call(y1, scale1, shift1, w2_9, mask,
                                  H=H, W=W, Cout=Cout)

    scale2, shift2 = _bn_scale_shift(st2, params["bn2"]["gamma"],
                                     params["bn2"]["beta"], count)

    # Final BN2-apply + ReLU on a lane-dense (N*H, (W+2)*Cout) view.
    y2d = y2.reshape(N * H, Wp * Cout)
    out = _bn_relu_call(y2d, jnp.tile(scale2, (1, Wp)), jnp.tile(shift2, (1, Wp)))
    out = out.reshape(N, H, Wp, Cout)[:, :, 1:W + 1, :]
    return jnp.transpose(out, (0, 3, 1, 2))    # NHWC -> NCHW


# ----------------------------------------------------------------------------
# Pure-JAX reference (with conv bias, to confirm the bias-fold is exact)
# ----------------------------------------------------------------------------
def _ref_conv(x, w, b):
    y = lax.conv_general_dilated(
        x, w, window_strides=(1, 1), padding="SAME",
        dimension_numbers=("NHWC", "HWIO", "NHWC"))
    return y + b


def _ref_bn_relu(x, gamma, beta):
    mean = jnp.mean(x, axis=(0, 1, 2), keepdims=True)
    var = jnp.mean(jnp.square(x - mean), axis=(0, 1, 2), keepdims=True)
    y = (x - mean) * lax.rsqrt(var + _EPS) * gamma + beta
    return jnp.maximum(y, 0.0)


def down_reference(params, x_nchw):
    x = jnp.transpose(x_nchw, (0, 2, 3, 1))
    x = _maxpool2(x)
    y = _ref_conv(x, params["conv1"]["w"], params["conv1"]["b"])
    y = _ref_bn_relu(y, params["bn1"]["gamma"], params["bn1"]["beta"])
    y = _ref_conv(y, params["conv2"]["w"], params["conv2"]["b"])
    y = _ref_bn_relu(y, params["bn2"]["gamma"], params["bn2"]["beta"])
    return jnp.transpose(y, (0, 3, 1, 2))


# ----------------------------------------------------------------------------
if __name__ == "__main__":
    key = jax.random.PRNGKey(0)
    N, Cin, H, W = 2, 4, 16, 16
    Cmid, Cout = 8, 8     # mid_channels defaults to out_channels in DoubleConv
    k1, k2, kx = jax.random.split(key, 3)

    def conv_p(k, cin, cout, ksz=3):
        kw_, kb_ = jax.random.split(k)
        std = 1.0 / (cin * ksz * ksz) ** 0.5
        return {"w": jax.random.normal(kw_, (ksz, ksz, cin, cout),
                                       jnp.float32) * std,
                "b": jax.random.normal(kb_, (cout,), jnp.float32) * 0.01}

    params = {
        "conv1": conv_p(k1, Cin, Cmid),
        "bn1": {"gamma": jnp.ones((Cmid,), jnp.float32),
                "beta": jnp.zeros((Cmid,), jnp.float32)},
        "conv2": conv_p(k2, Cmid, Cout),
        "bn2": {"gamma": jnp.ones((Cout,), jnp.float32),
                "beta": jnp.zeros((Cout,), jnp.float32)},
    }

    x = jax.random.normal(kx, (N, Cin, H, W), jnp.float32)

    out = down_forward(params, x)
    out = jax.block_until_ready(out)

    assert out.shape == (N, Cout, H // 2, W // 2), out.shape
    assert bool(jnp.all(jnp.isfinite(out)))

    ref = down_reference(params, x)
    max_err = float(jnp.max(jnp.abs(out - ref)))
    assert max_err < 0.25, f"max abs err vs reference: {max_err}"

    print("KERNEL_OK")
</pallas_src>

<mosaic_0001>
module attributes {stable_mosaic.version = 11 : i64} {
  func.func @_conv_stats_kernel(%arg0: i32, %arg1: memref<1x112x4xbf16, #tpu.memory_space<vmem>>, %arg2: memref<9x4x8xbf16, #tpu.memory_space<vmem>>, %arg3: memref<80x1xf32, #tpu.memory_space<vmem>>, %arg4: memref<1x80x8xf32, #tpu.memory_space<vmem>>, %arg5: memref<1x2x8xf32, #tpu.memory_space<vmem>>) attributes {dimension_semantics = [#tpu.dimension_semantics<parallel>], iteration_bounds = array<i64: 2>, scalar_prefetch = 0 : i64, scratch_operands = 0 : i64, tpu.core_type = #tpu.core_type<tc>, window_params = [{transform_indices = @transform_0, window_bounds = array<i64: 1, 112, 4>}, {pipeline_mode = #tpu.pipeline_mode<synchronous>, transform_indices = @transform_1, window_bounds = array<i64: 9, 4, 8>}, {pipeline_mode = #tpu.pipeline_mode<synchronous>, transform_indices = @transform_2, window_bounds = array<i64: 80, 1>}, {transform_indices = @transform_3, window_bounds = array<i64: 1, 80, 8>}, {transform_indices = @transform_4, window_bounds = array<i64: 1, 2, 8>}]} {
    %c0 = arith.constant 0 : index
    %c0_0 = arith.constant 0 : index
    %c0_1 = arith.constant 0 : index
    %0 = vector.load %arg1[%c0, %c0_0, %c0_1] : memref<1x112x4xbf16, #tpu.memory_space<vmem>>, vector<1x112x4xbf16>
    %1 = vector.shape_cast %0 : vector<1x112x4xbf16> to vector<112x4xbf16>
    %c0_2 = arith.constant 0 : index
    %c0_3 = arith.constant 0 : index
    %c0_4 = arith.constant 0 : index
    %2 = vector.load %arg2[%c0_2, %c0_3, %c0_4] : memref<9x4x8xbf16, #tpu.memory_space<vmem>>, vector<9x4x8xbf16>
    %cst = arith.constant 0.000000e+00 : f32
    %3 = vector.broadcast %cst : f32 to vector<80x8xf32>
    %4 = vector.extract_strided_slice %1 {offsets = [5, 0], sizes = [80, 4], strides = [1, 1]} : vector<112x4xbf16> to vector<80x4xbf16>
    %5 = vector.extract_strided_slice %2 {offsets = [0, 0, 0], sizes = [1, 4, 8], strides = [1, 1, 1]} : vector<9x4x8xbf16> to vector<1x4x8xbf16>
    %6 = vector.shape_cast %5 : vector<1x4x8xbf16> to vector<4x8xbf16>
    %cst_5 = arith.constant dense<0.000000e+00> : vector<80x8xf32>
    %7 = tpu.matmul %4, %6, %cst_5 {dimension_numbers = #tpu.dot_dimension_numbers<[1], [0], [0], [1], [0, 0, 1, 1], [], []>} : vector<80x4xbf16>, vector<4x8xbf16>, vector<80x8xf32> -> vector<80x8xf32>
    %8 = arith.addf %3, %7 : vector<80x8xf32>
    %9 = vector.extract_strided_slice %1 {offsets = [6, 0], sizes = [80, 4], strides = [1, 1]} : vector<112x4xbf16> to vector<80x4xbf16>
    %10 = vector.extract_strided_slice %2 {offsets = [1, 0, 0], sizes = [1, 4, 8], strides = [1, 1, 1]} : vector<9x4x8xbf16> to vector<1x4x8xbf16>
    %11 = vector.shape_cast %10 : vector<1x4x8xbf16> to vector<4x8xbf16>
    %cst_6 = arith.constant dense<0.000000e+00> : vector<80x8xf32>
    %12 = tpu.matmul %9, %11, %cst_6 {dimension_numbers = #tpu.dot_dimension_numbers<[1], [0], [0], [1], [0, 0, 1, 1], [], []>} : vector<80x4xbf16>, vector<4x8xbf16>, vector<80x8xf32> -> vector<80x8xf32>
    %13 = arith.addf %8, %12 : vector<80x8xf32>
    %14 = vector.extract_strided_slice %1 {offsets = [7, 0], sizes = [80, 4], strides = [1, 1]} : vector<112x4xbf16> to vector<80x4xbf16>
    %15 = vector.extract_strided_slice %2 {offsets = [2, 0, 0], sizes = [1, 4, 8], strides = [1, 1, 1]} : vector<9x4x8xbf16> to vector<1x4x8xbf16>
    %16 = vector.shape_cast %15 : vector<1x4x8xbf16> to vector<4x8xbf16>
    %cst_7 = arith.constant dense<0.000000e+00> : vector<80x8xf32>
    %17 = tpu.matmul %14, %16, %cst_7 {dimension_numbers = #tpu.dot_dimension_numbers<[1], [0], [0], [1], [0, 0, 1, 1], [], []>} : vector<80x4xbf16>, vector<4x8xbf16>, vector<80x8xf32> -> vector<80x8xf32>
    %18 = arith.addf %13, %17 : vector<80x8xf32>
    %19 = vector.extract_strided_slice %1 {offsets = [15, 0], sizes = [80, 4], strides = [1, 1]} : vector<112x4xbf16> to vector<80x4xbf16>
    %20 = vector.extract_strided_slice %2 {offsets = [3, 0, 0], sizes = [1, 4, 8], strides = [1, 1, 1]} : vector<9x4x8xbf16> to vector<1x4x8xbf16>
    %21 = vector.shape_cast %20 : vector<1x4x8xbf16> to vector<4x8xbf16>
    %cst_8 = arith.constant dense<0.000000e+00> : vector<80x8xf32>
    %22 = tpu.matmul %19, %21, %cst_8 {dimension_numbers = #tpu.dot_dimension_numbers<[1], [0], [0], [1], [0, 0, 1, 1], [], []>} : vector<80x4xbf16>, vector<4x8xbf16>, vector<80x8xf32> -> vector<80x8xf32>
    %23 = arith.addf %18, %22 : vector<80x8xf32>
    %24 = vector.extract_strided_slice %1 {offsets = [16, 0], sizes = [80, 4], strides = [1, 1]} : vector<112x4xbf16> to vector<80x4xbf16>
    %25 = vector.extract_strided_slice %2 {offsets = [4, 0, 0], sizes = [1, 4, 8], strides = [1, 1, 1]} : vector<9x4x8xbf16> to vector<1x4x8xbf16>
    %26 = vector.shape_cast %25 : vector<1x4x8xbf16> to vector<4x8xbf16>
    %cst_9 = arith.constant dense<0.000000e+00> : vector<80x8xf32>
    %27 = tpu.matmul %24, %26, %cst_9 {dimension_numbers = #tpu.dot_dimension_numbers<[1], [0], [0], [1], [0, 0, 1, 1], [], []>} : vector<80x4xbf16>, vector<4x8xbf16>, vector<80x8xf32> -> vector<80x8xf32>
    %28 = arith.addf %23, %27 : vector<80x8xf32>
    %29 = vector.extract_strided_slice %1 {offsets = [17, 0], sizes = [80, 4], strides = [1, 1]} : vector<112x4xbf16> to vector<80x4xbf16>
    %30 = vector.extract_strided_slice %2 {offsets = [5, 0, 0], sizes = [1, 4, 8], strides = [1, 1, 1]} : vector<9x4x8xbf16> to vector<1x4x8xbf16>
    %31 = vector.shape_cast %30 : vector<1x4x8xbf16> to vector<4x8xbf16>
    %cst_10 = arith.constant dense<0.000000e+00> : vector<80x8xf32>
    %32 = tpu.matmul %29, %31, %cst_10 {dimension_numbers = #tpu.dot_dimension_numbers<[1], [0], [0], [1], [0, 0, 1, 1], [], []>} : vector<80x4xbf16>, vector<4x8xbf16>, vector<80x8xf32> -> vector<80x8xf32>
    %33 = arith.addf %28, %32 : vector<80x8xf32>
    %34 = vector.extract_strided_slice %1 {offsets = [25, 0], sizes = [80, 4], strides = [1, 1]} : vector<112x4xbf16> to vector<80x4xbf16>
    %35 = vector.extract_strided_slice %2 {offsets = [6, 0, 0], sizes = [1, 4, 8], strides = [1, 1, 1]} : vector<9x4x8xbf16> to vector<1x4x8xbf16>
    %36 = vector.shape_cast %35 : vector<1x4x8xbf16> to vector<4x8xbf16>
    %cst_11 = arith.constant dense<0.000000e+00> : vector<80x8xf32>
    %37 = tpu.matmul %34, %36, %cst_11 {dimension_numbers = #tpu.dot_dimension_numbers<[1], [0], [0], [1], [0, 0, 1, 1], [], []>} : vector<80x4xbf16>, vector<4x8xbf16>, vector<80x8xf32> -> vector<80x8xf32>
    %38 = arith.addf %33, %37 : vector<80x8xf32>
    %39 = vector.extract_strided_slice %1 {offsets = [26, 0], sizes = [80, 4], strides = [1, 1]} : vector<112x4xbf16> to vector<80x4xbf16>
    %40 = vector.extract_strided_slice %2 {offsets = [7, 0, 0], sizes = [1, 4, 8], strides = [1, 1, 1]} : vector<9x4x8xbf16> to vector<1x4x8xbf16>
    %41 = vector.shape_cast %40 : vector<1x4x8xbf16> to vector<4x8xbf16>
    %cst_12 = arith.constant dense<0.000000e+00> : vector<80x8xf32>
    %42 = tpu.matmul %39, %41, %cst_12 {dimension_numbers = #tpu.dot_dimension_numbers<[1], [0], [0], [1], [0, 0, 1, 1], [], []>} : vector<80x4xbf16>, vector<4x8xbf16>, vector<80x8xf32> -> vector<80x8xf32>
    %43 = arith.addf %38, %42 : vector<80x8xf32>
    %44 = vector.extract_strided_slice %1 {offsets = [27, 0], sizes = [80, 4], strides = [1, 1]} : vector<112x4xbf16> to vector<80x4xbf16>
    %45 = vector.extract_strided_slice %2 {offsets = [8, 0, 0], sizes = [1, 4, 8], strides = [1, 1, 1]} : vector<9x4x8xbf16> to vector<1x4x8xbf16>
    %46 = vector.shape_cast %45 : vector<1x4x8xbf16> to vector<4x8xbf16>
    %cst_13 = arith.constant dense<0.000000e+00> : vector<80x8xf32>
    %47 = tpu.matmul %44, %46, %cst_13 {dimension_numbers = #tpu.dot_dimension_numbers<[1], [0], [0], [1], [0, 0, 1, 1], [], []>} : vector<80x4xbf16>, vector<4x8xbf16>, vector<80x8xf32> -> vector<80x8xf32>
    %48 = arith.addf %43, %47 : vector<80x8xf32>
    %c0_14 = arith.constant 0 : index
    %c0_15 = arith.constant 0 : index
    %c0_16 = arith.constant 0 : index
    %49 = vector.load %arg4[%c0_14, %c0_15, %c0_16] : memref<1x80x8xf32, #tpu.memory_space<vmem>>, vector<1x80x8xf32>
    %50 = vector.shape_cast %49 : vector<1x80x8xf32> to vector<80x8xf32>
    %51 = vector.shape_cast %48 : vector<80x8xf32> to vector<1x80x8xf32>
    tpu.vector_store %arg4[%c0_14, %c0_15, %c0_16], %51 {strides = array<i32>} : memref<1x80x8xf32, #tpu.memory_space<vmem>>, vector<1x80x8xf32>,
    %c0_17 = arith.constant 0 : index
    %c0_18 = arith.constant 0 : index
    %52 = vector.load %arg3[%c0_17, %c0_18] : memref<80x1xf32, #tpu.memory_space<vmem>>, vector<80x1xf32>
    %53 = vector.broadcast %52 : vector<80x1xf32> to vector<80x8xf32>
    %54 = arith.mulf %48, %53 : vector<80x8xf32>
    %cst_19 = arith.constant dense<0.000000e+00> : vector<8xf32>
    %55 = vector.multi_reduction <add>, %54, %cst_19 [0] : vector<80x8xf32> to vector<8xf32>
    %56 = vector.shape_cast %55 : vector<8xf32> to vector<1x8xf32>
    %57 = arith.mulf %54, %48 : vector<80x8xf32>
    %cst_20 = arith.constant dense<0.000000e+00> : vector<8xf32>
    %58 = vector.multi_reduction <add>, %57, %cst_20 [0] : vector<80x8xf32> to vector<8xf32>
    %59 = vector.shape_cast %58 : vector<8xf32> to vector<1x8xf32>
    %60 = tpu.concatenate %56, %59 in 0 : vector<1x8xf32>, vector<1x8xf32> -> vector<2x8xf32>
    %c0_21 = arith.constant 0 : index
    %c0_22 = arith.constant 0 : index
    %c0_23 = arith.constant 0 : index
    %61 = vector.load %arg5[%c0_21, %c0_22, %c0_23] : memref<1x2x8xf32, #tpu.memory_space<vmem>>, vector<1x2x8xf32>
    %62 = vector.shape_cast %61 : vector<1x2x8xf32> to vector<2x8xf32>
    %63 = vector.shape_cast %60 : vector<2x8xf32> to vector<1x2x8xf32>
    tpu.vector_store %arg5[%c0_21, %c0_22, %c0_23], %63 {strides = array<i32>} : memref<1x2x8xf32, #tpu.memory_space<vmem>>, vector<1x2x8xf32>,
    return
  }
  func.func @transform_0(%arg0: i32) -> (i32, i32, i32) {
    %c0_i32 = arith.constant 0 : i32
    %c0_i32_0 = arith.constant 0 : i32
    %c0_i32_1 = arith.constant 0 : i32
    return %arg0, %c0_i32, %c0_i32_0 : i32, i32, i32
  }
  func.func @transform_1(%arg0: i32) -> (i32, i32, i32) {
    %c0_i32 = arith.constant 0 : i32
    %c0_i32_0 = arith.constant 0 : i32
    %c0_i32_1 = arith.constant 0 : i32
    %c0_i32_2 = arith.constant 0 : i32
    return %c0_i32, %c0_i32_0, %c0_i32_1 : i32, i32, i32
  }
  func.func @transform_2(%arg0: i32) -> (i32, i32) {
    %c0_i32 = arith.constant 0 : i32
    %c0_i32_0 = arith.constant 0 : i32
    %c0_i32_1 = arith.constant 0 : i32
    return %c0_i32, %c0_i32_0 : i32, i32
  }
  func.func @transform_3(%arg0: i32) -> (i32, i32, i32) {
    %c0_i32 = arith.constant 0 : i32
    %c0_i32_0 = arith.constant 0 : i32
    %c0_i32_1 = arith.constant 0 : i32
    return %arg0, %c0_i32, %c0_i32_0 : i32, i32, i32
  }
  func.func @transform_4(%arg0: i32) -> (i32, i32, i32) {
    %c0_i32 = arith.constant 0 : i32
    %c0_i32_0 = arith.constant 0 : i32
    %c0_i32_1 = arith.constant 0 : i32
    return %arg0, %c0_i32, %c0_i32_0 : i32, i32, i32
  }
}

module attributes {stable_mosaic.version = 11 : i64} {
  func.func @_bn_conv_stats_kernel(%arg0: i32, %arg1: memref<1x80x8xf32, #tpu.memory_space<vmem>>, %arg2: memref<1x8xf32, #tpu.memory_space<vmem>>, %arg3: memref<1x8xf32, #tpu.memory_space<vmem>>, %arg4: memref<9x8x8xbf16, #tpu.memory_space<vmem>>, %arg5: memref<80x1xf32, #tpu.memory_space<vmem>>, %arg6: memref<1x80x8xf32, #tpu.memory_space<vmem>>, %arg7: memref<1x2x8xf32, #tpu.memory_space<vmem>>) attributes {dimension_semantics = [#tpu.dimension_semantics<parallel>], iteration_bounds = array<i64: 2>, scalar_prefetch = 0 : i64, scratch_operands = 0 : i64, tpu.core_type = #tpu.core_type<tc>, window_params = [{transform_indices = @transform_0, window_bounds = array<i64: 1, 80, 8>}, {pipeline_mode = #tpu.pipeline_mode<synchronous>, transform_indices = @transform_1, window_bounds = array<i64: 1, 8>}, {pipeline_mode = #tpu.pipeline_mode<synchronous>, transform_indices = @transform_2, window_bounds = array<i64: 1, 8>}, {pipeline_mode = #tpu.pipeline_mode<synchronous>, transform_indices = @transform_3, window_bounds = array<i64: 9, 8, 8>}, {pipeline_mode = #tpu.pipeline_mode<synchronous>, transform_indices = @transform_4, window_bounds = array<i64: 80, 1>}, {transform_indices = @transform_5, window_bounds = array<i64: 1, 80, 8>}, {transform_indices = @transform_6, window_bounds = array<i64: 1, 2, 8>}]} {
    %c0 = arith.constant 0 : index
    %c0_0 = arith.constant 0 : index
    %0 = vector.load %arg5[%c0, %c0_0] : memref<80x1xf32, #tpu.memory_space<vmem>>, vector<80x1xf32>
    %c0_1 = arith.constant 0 : index
    %c0_2 = arith.constant 0 : index
    %c0_3 = arith.constant 0 : index
    %1 = vector.load %arg1[%c0_1, %c0_2, %c0_3] : memref<1x80x8xf32, #tpu.memory_space<vmem>>, vector<1x80x8xf32>
    %2 = vector.shape_cast %1 : vector<1x80x8xf32> to vector<80x8xf32>
    %c0_4 = arith.constant 0 : index
    %c0_5 = arith.constant 0 : index
    %3 = vector.load %arg2[%c0_4, %c0_5] : memref<1x8xf32, #tpu.memory_space<vmem>>, vector<1x8xf32>
    %4 = vector.broadcast %3 : vector<1x8xf32> to vector<80x8xf32>
    %5 = arith.mulf %2, %4 : vector<80x8xf32>
    %c0_6 = arith.constant 0 : index
    %c0_7 = arith.constant 0 : index
    %6 = vector.load %arg3[%c0_6, %c0_7] : memref<1x8xf32, #tpu.memory_space<vmem>>, vector<1x8xf32>
    %7 = vector.broadcast %6 : vector<1x8xf32> to vector<80x8xf32>
    %8 = arith.addf %5, %7 : vector<80x8xf32>
    %cst = arith.constant 0.000000e+00 : f32
    %9 = vector.broadcast %cst : f32 to vector<80x8xf32>
    %10 = arith.maximumf %8, %9 : vector<80x8xf32>
    %11 = vector.broadcast %0 : vector<80x1xf32> to vector<80x8xf32>
    %12 = arith.mulf %10, %11 : vector<80x8xf32>
    %13 = arith.truncf %12 : vector<80x8xf32> to vector<80x8xbf16>
    %cst_8 = arith.constant 0.000000e+00 : bf16
    %14 = vector.broadcast %cst_8 : bf16 to vector<16x8xbf16>
    %15 = tpu.concatenate %14, %13, %14 in 0 : vector<16x8xbf16>, vector<80x8xbf16>, vector<16x8xbf16> -> vector<112x8xbf16>
    %c0_9 = arith.constant 0 : index
    %c0_10 = arith.constant 0 : index
    %c0_11 = arith.constant 0 : index
    %16 = vector.load %arg4[%c0_9, %c0_10, %c0_11] : memref<9x8x8xbf16, #tpu.memory_space<vmem>>, vector<9x8x8xbf16>
    %cst_12 = arith.constant 0.000000e+00 : f32
    %17 = vector.broadcast %cst_12 : f32 to vector<80x8xf32>
    %18 = vector.extract_strided_slice %15 {offsets = [5, 0], sizes = [80, 8], strides = [1, 1]} : vector<112x8xbf16> to vector<80x8xbf16>
    %19 = vector.extract_strided_slice %16 {offsets = [0, 0, 0], sizes = [1, 8, 8], strides = [1, 1, 1]} : vector<9x8x8xbf16> to vector<1x8x8xbf16>
    %20 = vector.shape_cast %19 : vector<1x8x8xbf16> to vector<8x8xbf16>
    %cst_13 = arith.constant dense<0.000000e+00> : vector<80x8xf32>
    %21 = tpu.matmul %18, %20, %cst_13 {dimension_numbers = #tpu.dot_dimension_numbers<[1], [0], [0], [1], [0, 0, 1, 1], [], []>} : vector<80x8xbf16>, vector<8x8xbf16>, vector<80x8xf32> -> vector<80x8xf32>
    %22 = arith.addf %17, %21 : vector<80x8xf32>
    %23 = vector.extract_strided_slice %15 {offsets = [6, 0], sizes = [80, 8], strides = [1, 1]} : vector<112x8xbf16> to vector<80x8xbf16>
    %24 = vector.extract_strided_slice %16 {offsets = [1, 0, 0], sizes = [1, 8, 8], strides = [1, 1, 1]} : vector<9x8x8xbf16> to vector<1x8x8xbf16>
    %25 = vector.shape_cast %24 : vector<1x8x8xbf16> to vector<8x8xbf16>
    %cst_14 = arith.constant dense<0.000000e+00> : vector<80x8xf32>
    %26 = tpu.matmul %23, %25, %cst_14 {dimension_numbers = #tpu.dot_dimension_numbers<[1], [0], [0], [1], [0, 0, 1, 1], [], []>} : vector<80x8xbf16>, vector<8x8xbf16>, vector<80x8xf32> -> vector<80x8xf32>
    %27 = arith.addf %22, %26 : vector<80x8xf32>
    %28 = vector.extract_strided_slice %15 {offsets = [7, 0], sizes = [80, 8], strides = [1, 1]} : vector<112x8xbf16> to vector<80x8xbf16>
    %29 = vector.extract_strided_slice %16 {offsets = [2, 0, 0], sizes = [1, 8, 8], strides = [1, 1, 1]} : vector<9x8x8xbf16> to vector<1x8x8xbf16>
    %30 = vector.shape_cast %29 : vector<1x8x8xbf16> to vector<8x8xbf16>
    %cst_15 = arith.constant dense<0.000000e+00> : vector<80x8xf32>
    %31 = tpu.matmul %28, %30, %cst_15 {dimension_numbers = #tpu.dot_dimension_numbers<[1], [0], [0], [1], [0, 0, 1, 1], [], []>} : vector<80x8xbf16>, vector<8x8xbf16>, vector<80x8xf32> -> vector<80x8xf32>
    %32 = arith.addf %27, %31 : vector<80x8xf32>
    %33 = vector.extract_strided_slice %15 {offsets = [15, 0], sizes = [80, 8], strides = [1, 1]} : vector<112x8xbf16> to vector<80x8xbf16>
    %34 = vector.extract_strided_slice %16 {offsets = [3, 0, 0], sizes = [1, 8, 8], strides = [1, 1, 1]} : vector<9x8x8xbf16> to vector<1x8x8xbf16>
    %35 = vector.shape_cast %34 : vector<1x8x8xbf16> to vector<8x8xbf16>
    %cst_16 = arith.constant dense<0.000000e+00> : vector<80x8xf32>
    %36 = tpu.matmul %33, %35, %cst_16 {dimension_numbers = #tpu.dot_dimension_numbers<[1], [0], [0], [1], [0, 0, 1, 1], [], []>} : vector<80x8xbf16>, vector<8x8xbf16>, vector<80x8xf32> -> vector<80x8xf32>
    %37 = arith.addf %32, %36 : vector<80x8xf32>
    %38 = vector.extract_strided_slice %15 {offsets = [16, 0], sizes = [80, 8], strides = [1, 1]} : vector<112x8xbf16> to vector<80x8xbf16>
    %39 = vector.extract_strided_slice %16 {offsets = [4, 0, 0], sizes = [1, 8, 8], strides = [1, 1, 1]} : vector<9x8x8xbf16> to vector<1x8x8xbf16>
    %40 = vector.shape_cast %39 : vector<1x8x8xbf16> to vector<8x8xbf16>
    %cst_17 = arith.constant dense<0.000000e+00> : vector<80x8xf32>
    %41 = tpu.matmul %38, %40, %cst_17 {dimension_numbers = #tpu.dot_dimension_numbers<[1], [0], [0], [1], [0, 0, 1, 1], [], []>} : vector<80x8xbf16>, vector<8x8xbf16>, vector<80x8xf32> -> vector<80x8xf32>
    %42 = arith.addf %37, %41 : vector<80x8xf32>
    %43 = vector.extract_strided_slice %15 {offsets = [17, 0], sizes = [80, 8], strides = [1, 1]} : vector<112x8xbf16> to vector<80x8xbf16>
    %44 = vector.extract_strided_slice %16 {offsets = [5, 0, 0], sizes = [1, 8, 8], strides = [1, 1, 1]} : vector<9x8x8xbf16> to vector<1x8x8xbf16>
    %45 = vector.shape_cast %44 : vector<1x8x8xbf16> to vector<8x8xbf16>
    %cst_18 = arith.constant dense<0.000000e+00> : vector<80x8xf32>
    %46 = tpu.matmul %43, %45, %cst_18 {dimension_numbers = #tpu.dot_dimension_numbers<[1], [0], [0], [1], [0, 0, 1, 1], [], []>} : vector<80x8xbf16>, vector<8x8xbf16>, vector<80x8xf32> -> vector<80x8xf32>
    %47 = arith.addf %42, %46 : vector<80x8xf32>
    %48 = vector.extract_strided_slice %15 {offsets = [25, 0], sizes = [80, 8], strides = [1, 1]} : vector<112x8xbf16> to vector<80x8xbf16>
    %49 = vector.extract_strided_slice %16 {offsets = [6, 0, 0], sizes = [1, 8, 8], strides = [1, 1, 1]} : vector<9x8x8xbf16> to vector<1x8x8xbf16>
    %50 = vector.shape_cast %49 : vector<1x8x8xbf16> to vector<8x8xbf16>
    %cst_19 = arith.constant dense<0.000000e+00> : vector<80x8xf32>
    %51 = tpu.matmul %48, %50, %cst_19 {dimension_numbers = #tpu.dot_dimension_numbers<[1], [0], [0], [1], [0, 0, 1, 1], [], []>} : vector<80x8xbf16>, vector<8x8xbf16>, vector<80x8xf32> -> vector<80x8xf32>
    %52 = arith.addf %47, %51 : vector<80x8xf32>
    %53 = vector.extract_strided_slice %15 {offsets = [26, 0], sizes = [80, 8], strides = [1, 1]} : vector<112x8xbf16> to vector<80x8xbf16>
    %54 = vector.extract_strided_slice %16 {offsets = [7, 0, 0], sizes = [1, 8, 8], strides = [1, 1, 1]} : vector<9x8x8xbf16> to vector<1x8x8xbf16>
    %55 = vector.shape_cast %54 : vector<1x8x8xbf16> to vector<8x8xbf16>
    %cst_20 = arith.constant dense<0.000000e+00> : vector<80x8xf32>
    %56 = tpu.matmul %53, %55, %cst_20 {dimension_numbers = #tpu.dot_dimension_numbers<[1], [0], [0], [1], [0, 0, 1, 1], [], []>} : vector<80x8xbf16>, vector<8x8xbf16>, vector<80x8xf32> -> vector<80x8xf32>
    %57 = arith.addf %52, %56 : vector<80x8xf32>
    %58 = vector.extract_strided_slice %15 {offsets = [27, 0], sizes = [80, 8], strides = [1, 1]} : vector<112x8xbf16> to vector<80x8xbf16>
    %59 = vector.extract_strided_slice %16 {offsets = [8, 0, 0], sizes = [1, 8, 8], strides = [1, 1, 1]} : vector<9x8x8xbf16> to vector<1x8x8xbf16>
    %60 = vector.shape_cast %59 : vector<1x8x8xbf16> to vector<8x8xbf16>
    %cst_21 = arith.constant dense<0.000000e+00> : vector<80x8xf32>
    %61 = tpu.matmul %58, %60, %cst_21 {dimension_numbers = #tpu.dot_dimension_numbers<[1], [0], [0], [1], [0, 0, 1, 1], [], []>} : vector<80x8xbf16>, vector<8x8xbf16>, vector<80x8xf32> -> vector<80x8xf32>
    %62 = arith.addf %57, %61 : vector<80x8xf32>
    %c0_22 = arith.constant 0 : index
    %c0_23 = arith.constant 0 : index
    %c0_24 = arith.constant 0 : index
    %63 = vector.load %arg6[%c0_22, %c0_23, %c0_24] : memref<1x80x8xf32, #tpu.memory_space<vmem>>, vector<1x80x8xf32>
    %64 = vector.shape_cast %63 : vector<1x80x8xf32> to vector<80x8xf32>
    %65 = vector.shape_cast %62 : vector<80x8xf32> to vector<1x80x8xf32>
    tpu.vector_store %arg6[%c0_22, %c0_23, %c0_24], %65 {strides = array<i32>} : memref<1x80x8xf32, #tpu.memory_space<vmem>>, vector<1x80x8xf32>,
    %66 = vector.broadcast %0 : vector<80x1xf32> to vector<80x8xf32>
    %67 = arith.mulf %62, %66 : vector<80x8xf32>
    %cst_25 = arith.constant dense<0.000000e+00> : vector<8xf32>
    %68 = vector.multi_reduction <add>, %67, %cst_25 [0] : vector<80x8xf32> to vector<8xf32>
    %69 = vector.shape_cast %68 : vector<8xf32> to vector<1x8xf32>
    %70 = arith.mulf %67, %62 : vector<80x8xf32>
    %cst_26 = arith.constant dense<0.000000e+00> : vector<8xf32>
    %71 = vector.multi_reduction <add>, %70, %cst_26 [0] : vector<80x8xf32> to vector<8xf32>
    %72 = vector.shape_cast %71 : vector<8xf32> to vector<1x8xf32>
    %73 = tpu.concatenate %69, %72 in 0 : vector<1x8xf32>, vector<1x8xf32> -> vector<2x8xf32>
    %c0_27 = arith.constant 0 : index
    %c0_28 = arith.constant 0 : index
    %c0_29 = arith.constant 0 : index
    %74 = vector.load %arg7[%c0_27, %c0_28, %c0_29] : memref<1x2x8xf32, #tpu.memory_space<vmem>>, vector<1x2x8xf32>
    %75 = vector.shape_cast %74 : vector<1x2x8xf32> to vector<2x8xf32>
    %76 = vector.shape_cast %73 : vector<2x8xf32> to vector<1x2x8xf32>
    tpu.vector_store %arg7[%c0_27, %c0_28, %c0_29], %76 {strides = array<i32>} : memref<1x2x8xf32, #tpu.memory_space<vmem>>, vector<1x2x8xf32>,
    return
  }
  func.func @transform_0(%arg0: i32) -> (i32, i32, i32) {
    %c0_i32 = arith.constant 0 : i32
    %c0_i32_0 = arith.constant 0 : i32
    %c0_i32_1 = arith.constant 0 : i32
    return %arg0, %c0_i32, %c0_i32_0 : i32, i32, i32
  }
  func.func @transform_1(%arg0: i32) -> (i32, i32) {
    %c0_i32 = arith.constant 0 : i32
    %c0_i32_0 = arith.constant 0 : i32
    %c0_i32_1 = arith.constant 0 : i32
    return %c0_i32, %c0_i32_0 : i32, i32
  }
  func.func @transform_2(%arg0: i32) -> (i32, i32) {
    %c0_i32 = arith.constant 0 : i32
    %c0_i32_0 = arith.constant 0 : i32
    %c0_i32_1 = arith.constant 0 : i32
    return %c0_i32, %c0_i32_0 : i32, i32
  }
  func.func @transform_3(%arg0: i32) -> (i32, i32, i32) {
    %c0_i32 = arith.constant 0 : i32
    %c0_i32_0 = arith.constant 0 : i32
    %c0_i32_1 = arith.constant 0 : i32
    %c0_i32_2 = arith.constant 0 : i32
    return %c0_i32, %c0_i32_0, %c0_i32_1 : i32, i32, i32
  }
  func.func @transform_4(%arg0: i32) -> (i32, i32) {
    %c0_i32 = arith.constant 0 : i32
    %c0_i32_0 = arith.constant 0 : i32
    %c0_i32_1 = arith.constant 0 : i32
    return %c0_i32, %c0_i32_0 : i32, i32
  }
  func.func @transform_5(%arg0: i32) -> (i32, i32, i32) {
    %c0_i32 = arith.constant 0 : i32
    %c0_i32_0 = arith.constant 0 : i32
    %c0_i32_1 = arith.constant 0 : i32
    return %arg0, %c0_i32, %c0_i32_0 : i32, i32, i32
  }
  func.func @transform_6(%arg0: i32) -> (i32, i32, i32) {
    %c0_i32 = arith.constant 0 : i32
    %c0_i32_0 = arith.constant 0 : i32
    %c0_i32_1 = arith.constant 0 : i32
    return %arg0, %c0_i32, %c0_i32_0 : i32, i32, i32
  }
}

module attributes {stable_mosaic.version = 11 : i64} {
  func.func @_bn_relu_kernel(%arg0: i32, %arg1: memref<16x80xf32, #tpu.memory_space<vmem>>, %arg2: memref<1x80xf32, #tpu.memory_space<vmem>>, %arg3: memref<1x80xf32, #tpu.memory_space<vmem>>, %arg4: memref<16x80xf32, #tpu.memory_space<vmem>>) attributes {dimension_semantics = [#tpu.dimension_semantics<parallel>], iteration_bounds = array<i64: 1>, scalar_prefetch = 0 : i64, scratch_operands = 0 : i64, tpu.core_type = #tpu.core_type<tc>, window_params = [{transform_indices = @transform_0, window_bounds = array<i64: 16, 80>}, {pipeline_mode = #tpu.pipeline_mode<synchronous>, transform_indices = @transform_1, window_bounds = array<i64: 1, 80>}, {pipeline_mode = #tpu.pipeline_mode<synchronous>, transform_indices = @transform_2, window_bounds = array<i64: 1, 80>}, {transform_indices = @transform_3, window_bounds = array<i64: 16, 80>}]} {
    %c0 = arith.constant 0 : index
    %c0_0 = arith.constant 0 : index
    %0 = vector.load %arg1[%c0, %c0_0] : memref<16x80xf32, #tpu.memory_space<vmem>>, vector<16x80xf32>
    %c0_1 = arith.constant 0 : index
    %c0_2 = arith.constant 0 : index
    %1 = vector.load %arg2[%c0_1, %c0_2] : memref<1x80xf32, #tpu.memory_space<vmem>>, vector<1x80xf32>
    %2 = vector.broadcast %1 : vector<1x80xf32> to vector<16x80xf32>
    %3 = arith.mulf %0, %2 : vector<16x80xf32>
    %c0_3 = arith.constant 0 : index
    %c0_4 = arith.constant 0 : index
    %4 = vector.load %arg3[%c0_3, %c0_4] : memref<1x80xf32, #tpu.memory_space<vmem>>, vector<1x80xf32>
    %5 = vector.broadcast %4 : vector<1x80xf32> to vector<16x80xf32>
    %6 = arith.addf %3, %5 : vector<16x80xf32>
    %cst = arith.constant 0.000000e+00 : f32
    %7 = vector.broadcast %cst : f32 to vector<16x80xf32>
    %8 = arith.maximumf %6, %7 : vector<16x80xf32>
    %c0_5 = arith.constant 0 : index
    %c0_6 = arith.constant 0 : index
    %9 = vector.load %arg4[%c0_5, %c0_6] : memref<16x80xf32, #tpu.memory_space<vmem>>, vector<16x80xf32>
    tpu.vector_store %arg4[%c0_5, %c0_6], %8 {strides = array<i32>} : memref<16x80xf32, #tpu.memory_space<vmem>>, vector<16x80xf32>,
    return
  }
  func.func @transform_0(%arg0: i32) -> (i32, i32) {
    %c0_i32 = arith.constant 0 : i32
    %c0_i32_0 = arith.constant 0 : i32
    return %arg0, %c0_i32 : i32, i32
  }
  func.func @transform_1(%arg0: i32) -> (i32, i32) {
    %c0_i32 = arith.constant 0 : i32
    %c0_i32_0 = arith.constant 0 : i32
    %c0_i32_1 = arith.constant 0 : i32
    return %c0_i32, %c0_i32_0 : i32, i32
  }
  func.func @transform_2(%arg0: i32) -> (i32, i32) {
    %c0_i32 = arith.constant 0 : i32
    %c0_i32_0 = arith.constant 0 : i32
    %c0_i32_1 = arith.constant 0 : i32
    return %c0_i32, %c0_i32_0 : i32, i32
  }
  func.func @transform_3(%arg0: i32) -> (i32, i32) {
    %c0_i32 = arith.constant 0 : i32
    %c0_i32_0 = arith.constant 0 : i32
    return %arg0, %c0_i32 : i32, i32
  }
}

</mosaic_0001>

<bundles_post_ra>
// kernel: down_forward.5
= control target key start
LH: loop header
LB: loop body
LE: loop exit
PB: predicated region body
PF: predicated region fallthrough
CT: control target
= control target key end

     0   :  { %vm36_vm0 = vcmask 654336   ;;  %s83_s0 = inlined_call_operand.vmem [shape: f32[16,80], index: 0, kind: input, shape index: {}]   ;;  %s84_s1 = inlined_call_operand.vmem [shape: f32[1,80], index: 1, kind: input, shape index: {}]   ;;  %s85_s2 = inlined_call_operand.vmem [shape: f32[1,80], index: 2, kind: input, shape index: {}]   ;;  %s86_s3 = inlined_call_operand.vmem [shape: f32[16,80], index: 3, kind: output, shape index: {}]  }
   0x1   :  { %v14_v0 = vld [vmem:[%s83_s0] sm:$0xff]  ;;  %v15_v4 = vld [vmem:[%s83_s0 + $0x8] sm:$0xff] }
   0x2   :  { %v43_v1 = vld [vmem:[%s84_s1] ss:$0 sm:$0xff] }
   0x3   :  { %v44_v2 = vld [vmem:[%s85_s2] ss:$0 sm:$0xff]  ;;  %v23_v3 = vmul.f32 %v43_v1, %v14_v0  ;;  %v24_v5 = vmul.f32 %v43_v1, %v15_v4 }
   0x5   :  { %v32_v6 = vadd.f32 %v44_v2, %v23_v3  ;;  %v33_v7 = vadd.f32 %v44_v2, %v24_v5 }
   0x7   :  { %v34_v8 = vmax.f32 %v32_v6, 0.0  ;;  %v35_v9 = vmax.f32 %v33_v7, 0.0 }
   0x9   :  { %37 = vst.msk [vmem:[%s86_s3] sm:$0xff] %vm36_vm0, %v34_v8  ;;  %38 = vst.msk [vmem:[%s86_s3 + $0x8] sm:$0xff] %vm36_vm0, %v35_v9 }

// kernel: down_forward.3
= control target key start
LH: loop header
LB: loop body
LE: loop exit
PB: predicated region body
PF: predicated region fallthrough
CT: control target
= control target key end

     0   :  { %s2016_s15 = smov 0   ;;  %s2696_s0 = inlined_call_operand.vmem [shape: bf16[2,112,4], index: 0, kind: input, shape index: {}]   ;;  %s2697_s1 = inlined_call_operand.vmem [shape: bf16[9,4,8], index: 1, kind: input, shape index: {}]   ;;  %s2698_s2 = inlined_call_operand.vmem [shape: f32[80,1], index: 2, kind: input, shape index: {}]   ;;  %s2699_s3 = inlined_call_operand.vmem [shape: f32[2,80,8], index: 3, kind: output, shape index: {0}]   ;;  %s2700_s4 = inlined_call_operand.vmem [shape: f32[2,2,8], index: 4, kind: output, shape index: {1}]  }
   0x1 LB: > { %s1624_s16 = sadd.s32 4294967295, %s1986_s15   ;;  %p1628_p0 = scmp.ge.s32.totalorder %s1986_s15, 1  ;;  %s1986_s15 = sphi %s2016_s15, %s15_s15  }
   0x2   : > { %p165_p1 = scmp.lt.s32.totalorder %s1986_s15, 3 }
   0x4   : > { %p166_p2 = pnand %p1628_p0, %p165_p1 }
   0x5   : > { %p195_p3 = scmp.lt.s32.totalorder (!%p166_p2), %s1624_s16, 1 }
   0x6   : > { %169 = sbr.rel (%p166_p2) target bundleno = 418 (0x1a2), region = 32 }
   0xb   : > { %v225_v0 = vld [vmem:[%s2697_s1 + $0x2] sm:$0x3]  ;;  %vm289_vm0 = vcmask 1041408   ;;  %v1988_v1 = vmov 0.0   ;;  %s2702_s16 = smov (!%p195_p3, %s1624_s16), 1  ;;  %vm1989_vm1 = vmmov 0  }
   0xc   : > { %1749 = vmatprep.subr.bf16.mxu0 %v1988_v1  ;;  %1947 = vmatprep.subr.bf16.mxu1 %v1988_v1  ;;  %v291_v2 = vsel %vm289_vm0, %v225_v0, 0  ;;  %s1949_s19 = smul.u32 56, %s2702_s16  ;;  %v226_v6 = vld [vmem:[%s2697_s1 + $0x4] sm:$0x3]  ;;  %v224_v11 = vld [vmem:[%s2697_s1] sm:$0x3] }
   0xd   : > { %1750 = vmatpush3.bf16.msra.mxu0 %v291_v2  ;;  %1948 = vmatpush3.bf16.msra.mxu1 %v291_v2  ;;  %vm261_vm2 = vcmask 1044480   ;;  %vm273_vm3 = vcmask 31744   ;;  %v551_v26 = vsel %vm289_vm0, %v226_v6, 0  ;;  %v436_v30 = vsel %vm289_vm0, %v224_v11, 0  ;;  %v227_v56 = vld [vmem:[%s2697_s1 + $0x6] sm:$0x3] }
   0xe   : > { %1751 = vmatprep.mubr.msk.bf16.mxu0 %vm1989_vm1, %v1988_v1  ;;  %1763 = vmatprep.mubr.msk.bf16.mxu1 %vm1989_vm1, %v1988_v1  ;;  %s2042_s22 = scalar_lea.vmem %s2696_s0, %s1949_s19  ;;  %vm366_vm4 = vsmask.f32 5376  ;;  %vm511_vm5 = vsmask.f32 4352  ;;  %v228_v61 = vld [vmem:[%s2697_s1 + $0x8] sm:$0x3] }
   0xf   : > { %1793 = vmatprep.subr.bf16.mxu0 %v1988_v1  ;;  %1771 = vmatprep.subr.bf16.mxu1 %v1988_v1  ;;  %v210_v3 = vld [vmem:[%s2042_s22] sm:$0xf]  ;;  %v2046_v4 = vld [vmem:[%s2042_s22 + $0x4] sm:$0xf]  ;;  %v2049_v5 = vld [vmem:[%s2042_s22 + $0x8] sm:$0xf] }
  0x10   : > { %v2055_v7 = vld [vmem:[%s2042_s22 + $0xc] sm:$0xf]  ;;  %v1632_v8 = vcombine.low %v210_v3, %v2046_v4  ;;  %v2059_v9 = vld [vmem:[%s2042_s22 + $0x18] sm:$0xf]  ;;  %v217_v10 = vld [vmem:[%s2042_s22 + $0x1c] sm:$0xf] }
  0x11   : > { %v2067_v12 = vcombine.low %v2049_v5, %v2055_v7  ;;  %v218_v13 = vld [vmem:[%s2042_s22 + $0x20] sm:$0xf]  ;;  %v219_v14 = vld [vmem:[%s2042_s22 + $0x24] sm:$0xf]  ;;  %v2072_v15 = vcombine.low %v2059_v9, %v217_v10  ;;  %v2075_v16 = vld [vmem:[%s2042_s22 + $0x10] sm:$0xf] }
  0x12   : > { %v262_v17 = vrot.slane %v1632_v8, 3  ;;  %v2077_v18 = vcombine.low %v218_v13, %v219_v14  ;;  %v2079_v19 = vcombine.low %v217_v10, %v218_v13  ;;  %v2082_v20 = vld [vmem:[%s2042_s22 + $0x14] sm:$0xf]  ;;  %v2085_v21 = vld [vmem:[%s2042_s22 + $0x28] sm:$0xf]  ;;  %v368_v33 = vshrl.u32 %v1632_v8, 16 }
  0x13   : > { %v263_v22 = vrot.slane %v2067_v12, 3  ;;  %v267_v23 = vrot.slane %v2072_v15, 3  ;;  %v2091_v24 = vcombine.low %v2075_v16, %v2082_v20  ;;  %v2097_v27 = vcombine.low %v2085_v21, %v2085_v21  ;;  %s1631_s13 = sshll.u32 %s2702_s16, 1 }
  0x14   : > { %v269_v25 = vrot.slane %v2077_v18, 3  ;;  %v2100_v28 = vcombine.low %v219_v14, %v2085_v21  ;;  %v371_v35 = vshll.u32 %v1632_v8, 16  ;;  %v2112_v36 = vshrl.u32 %v2067_v12, 16  ;;  %s208_s18 = scalar_lea.vmem %s2700_s4, %s1631_s13 }
  0x15   : > { %v264_v29 = vsel %vm261_vm2, %v262_v17, %v263_v22  ;;  %v265_v32 = vrot.slane %v2091_v24, 3  ;;  %v271_v34 = vrot.slane %v2097_v27, 3  ;;  %v2115_v37 = vshll.u32 %v2067_v12, 16 }
  0x16   : > { %1752 = vmatmul.mubr.msk.bf16.vlgmr.msra.gmra.mxu0 %vm273_vm3, %v264_v29  ;;  %v270_v31 = vsel %vm261_vm2, %v267_v23, %v269_v25  ;;  %v2122_v38 = vshrl.u32 %v2091_v24, 16  ;;  %v2125_v39 = vshll.u32 %v2091_v24, 16  ;;  %v370_v41 = vrot.slane %v368_v33, 2 }
  0x17   : > { %1764 = vmatmul.mubr.msk.bf16.vlgmr.msra.gmra.mxu1 %vm273_vm3, %v270_v31  ;;  %1794 = vmatpush3.bf16.msra.mxu0 %v551_v26  ;;  %v266_v40 = vsel %vm261_vm2, %v263_v22, %v265_v32  ;;  %v272_v42 = vsel %vm261_vm2, %v269_v25, %v271_v34  ;;  %v373_v43 = vrot.slane %v371_v35, 3  ;;  %v378_v44 = vrot.slane %v2112_v36, 2 }
  0x18   : > { %1772 = vmatpush3.bf16.msra.mxu1 %v436_v30  ;;  %1755 = vmatprep.mubr.msk.bf16.mxu0 %vm1989_vm1, %v1988_v1  ;;  %v381_v45 = vrot.slane %v2115_v37, 3  ;;  %v512_v46 = vrot.slane %v368_v33, 3  ;;  %v513_v47 = vrot.slane %v371_v35, 4  ;;  %v387_v48 = vrot.slane %v2122_v38, 2 }
  0x19   : > { %1767 = vmatprep.mubr.msk.bf16.mxu1 %vm1989_vm1, %v1988_v1  ;;  %1815 = vmatprep.subr.bf16.mxu1 %v1988_v1  ;;  %v390_v49 = vrot.slane %v2125_v39, 3  ;;  %v515_v50 = vrot.slane %v2112_v36, 3  ;;  %v516_v51 = vrot.slane %v2115_v37, 4  ;;  %v2140_v52 = vshrl.u32 %v2072_v15, 16 }
  0x1a   : > { %1837 = vmatprep.subr.bf16.mxu0 %v1988_v1  ;;  %v2143_v53 = vshll.u32 %v2072_v15, 16  ;;  %v374_v54 = vor.u32 %v373_v43, %v370_v41  ;;  %v382_v55 = vor.u32 %v381_v45, %v378_v44  ;;  %v268_v57 = vsel %vm261_vm2, %v265_v32, %v267_v23 }
  0x1b   : > { %v391_v58 = vor.u32 %v390_v49, %v387_v48  ;;  %v514_v59 = vor.u32 %v513_v47, %v512_v46  ;;  %v517_v60 = vor.u32 %v516_v51, %v515_v50  ;;  %v396_v62 = vrot.slane %v2140_v52, 2 }
  0x1c   : > { %v399_v63 = vrot.slane %v2143_v53, 3  ;;  %v519_v0 = vrot.slane %v2122_v38, 3  ;;  %v520_v2 = vrot.slane %v2125_v39, 4  ;;  %v383_v3 = vsel %vm366_vm4, %v374_v54, %v382_v55 }
  0x1d   : > { %v713_v6 = vsel %vm289_vm0, %v227_v56, 0  ;;  %v2161_v8 = vshrl.u32 %v2077_v18, 16  ;;  %v2165_v10 = vcombine.low %v2046_v4, %v2049_v5  ;;  %v811_v11 = vsel %vm289_vm0, %v228_v61, 0  ;;  %v2183_v5 = vld [vmem:[%s2042_s22 + $0x2c] sm:$0xf] }
  0x1e   : > { %1756 = vmatmul.mubr.msk.bf16.gmra.mxu0 %vm273_vm3, %v266_v40  ;;  %v2169_v13 = vshll.u32 %v2077_v18, 16  ;;  %vm899_vm6 = vsmask.f32 7424  ;;  %v2173_v14 = vcombine.low %v2055_v7, %v2075_v16  ;;  %v2177_v17 = vcombine.low %v2082_v20, %v2059_v9 }
  0x1f   : > { %1768 = vmatmul.mubr.msk.bf16.gmra.mxu1 %vm273_vm3, %v272_v42  ;;  %1759 = vmatprep.mubr.msk.bf16.mxu0 %vm1989_vm1, %v1988_v1  ;;  %v392_v22 = vsel %vm366_vm4, %v382_v55, %v391_v58  ;;  %v518_v4 = vsel %vm511_vm5, %v514_v59, %v517_v60  ;;  %v400_v23 = vor.u32 %v399_v63, %v396_v62  ;;  %v523_v16 = vrot.slane %v2140_v52, 3  ;;  %v222_v63 = vld [vmem:[%s2042_s22 + $0x30] sm:$0xf] }
  0x20   : > { %1773 = vmatprep.mubr.msk.bf16.mxu1 %vm1989_vm1, %v1988_v1  ;;  %v521_v7 = vor.u32 %v520_v2, %v519_v0  ;;  %v2190_v9 = vshrl.u32 %v2079_v19, 16  ;;  %v405_v20 = vrot.slane %v2161_v8, 2  ;;  %v2196_v25 = vshll.u32 %v2079_v19, 16 }
  0x21   : > { %v2199_v26 = vshrl.u32 %v2100_v28, 16  ;;  %v2202_v29 = vshll.u32 %v2100_v28, 16  ;;  %v408_v30 = vrot.slane %v2169_v13, 3  ;;  %v524_v31 = vrot.slane %v2143_v53, 4 }
  0x22   : > { %v673_v32 = vrot.slane %v2190_v9, 3  ;;  %v1658_v33 = vcombine.low %v2183_v5, %v2183_v5  ;;  %v676_v34 = vrot.slane %v2196_v25, 4  ;;  %v2215_v41 = vcombine.low %v2085_v21, %v2183_v5 }
  0x23   : > { %v682_v35 = vrot.slane %v2199_v26, 3  ;;  %v685_v40 = vrot.slane %v2202_v29, 4  ;;  %v522_v42 = vsel %vm511_vm5, %v517_v60, %v521_v7  ;;  %v412_v43 = vshrl.u32 %v2097_v27, 16 }
  0x24   : > { %v689_v44 = vshrl.u32 %v1658_v33, 16  ;;  %v692_v45 = vshll.u32 %v1658_v33, 16  ;;  %v2219_v46 = vor.u32 %v676_v34, %v673_v32  ;;  %v900_v48 = vrot.slane %v2115_v37, 1 }
  0x25   : > { %v686_v47 = vor.u32 %v685_v40, %v682_v35  ;;  %v902_v49 = vrot.slane %v2125_v39, 1  ;;  %v415_v50 = vshll.u32 %v2097_v27, 16  ;;  %v527_v51 = vrot.slane %v2161_v8, 3 }
  0x26   : > { %1760 = vmatmul.mubr.msk.bf16.gmra.mxu0 %vm273_vm3, %v268_v57  ;;  %v691_v54 = vrot.slane %v689_v44, 3  ;;  %v694_v21 = vrot.slane %v692_v45, 4  ;;  %v401_v55 = vsel %vm366_vm4, %v391_v58, %v400_v23  ;;  %v901_v57 = vor.u32 %v900_v48, %v2112_v36 }
  0x27   : > { %1774 = vmatmul.mubr.msk.bf16.vlgmr.msra.gmra.mxu1 %vm273_vm3, %v383_v3  ;;  %1795 = vmatprep.mubr.msk.bf16.mxu0 %vm1989_vm1, %v1988_v1  ;;  %v2229_v56 = vsel %vm511_vm5, %v2219_v46, %v686_v47  ;;  %v904_v37 = vor.u32 %v902_v49, %v2122_v38  ;;  %v2234_v39 = vor.u32 %v408_v30, %v405_v20  ;;  %v905_v61 = vrot.slane %v2143_v53, 1 }
  0x28   : > { %1816 = vmatpush3.bf16.msra.mxu1 %v713_v6  ;;  %1777 = vmatprep.mubr.msk.bf16.mxu1 %vm1989_vm1, %v1988_v1  ;;  %v2236_v59 = vor.u32 %v524_v31, %v523_v16  ;;  %v695_v60 = vor.u32 %v694_v21, %v691_v54  ;;  %v528_v36 = vrot.slane %v2169_v13, 4  ;;  %v2245_v38 = vsel %vm899_vm6, %v901_v57, %v902_v49 }
  0x29   : > { %1859 = vmatprep.subr.bf16.mxu1 %v1988_v1  ;;  %v908_v58 = vrot.slane %v2169_v13, 1  ;;  %v1033_v62 = vrot.slane %v2196_v25, 1  ;;  %v2252_v0 = vrot.slane %v412_v43, 2  ;;  %v2259_v2 = vsel %vm899_vm6, %v904_v37, %v905_v61 }
  0x2a   : > { %v2256_v53 = vsel %vm511_vm5, %v686_v47, %v695_v60  ;;  %v907_v3 = vor.u32 %v905_v61, %v2140_v52  ;;  %v2264_v6 = vrot.slane %v415_v50, 3  ;;  %v410_v16 = vsel %vm366_vm4, %v400_v23, %v2234_v39 }
  0x2b   : > { %v1036_v52 = vrot.slane %v2202_v29, 1  ;;  %v1670_v30 = vcombine.low %v222_v63, %v222_v63  ;;  %v526_v31 = vsel %vm511_vm5, %v521_v7, %v2236_v59  ;;  %v915_v33 = vshrl.u32 %v2215_v41, 16 }
  0x2c   : > { %v2274_v20 = vsel %vm899_vm6, %v907_v3, %v908_v58  ;;  %v2281_v34 = vcombine.low %v2183_v5, %v222_v63  ;;  %v2284_v35 = vshrl.u32 %v2173_v14, 16  ;;  %v2287_v23 = vshll.u32 %v2173_v14, 16 }
  0x2d   : > { %v919_v44 = vshll.u32 %v1670_v30, 16  ;;  %v1038_v47 = vor.u32 %v1036_v52, %v2199_v26  ;;  %v2302_v48 = vshrl.u32 %v2177_v17, 16  ;;  %vm1153_vm7 = vcmask 1046528  }
  0x2e   : > { %1796 = vmatmul.mubr.msk.bf16.vlgmr.msra.gmra.mxu0 %vm273_vm3, %v518_v4  ;;  %v1035_v4 = vor.u32 %v1033_v62, %v2190_v9  ;;  %v1040_v5 = vshll.u32 %v2281_v34, 16  ;;  %v2308_v54 = vshll.u32 %v2177_v17, 16  ;;  %v1157_v57 = vrot.slane %v2079_v19, 1 }
  0x2f   : > { %1778 = vmatmul.mubr.msk.bf16.gmra.mxu1 %vm273_vm3, %v392_v22  ;;  %1838 = vmatpush3.bf16.msra.mxu0 %v811_v11  ;;  %v910_v11 = vor.u32 %v908_v58, %v2161_v8  ;;  %v911_v22 = vshll.u32 %v2215_v41, 16  ;;  %v921_v49 = vrot.slane %v919_v44, 1  ;;  %v1267_v60 = vrot.slane %v2284_v35, 1 }
  0x30   : > { %1781 = vmatprep.mubr.msk.bf16.mxu1 %vm1989_vm1, %v1988_v1  ;;  %1799 = vmatprep.mubr.msk.bf16.mxu0 %vm1989_vm1, %v1988_v1  ;;  %v2290_v40 = vsel %vm899_vm6, %v1035_v4, %v1036_v52  ;;  %v2310_v21 = vrot.slane %v1040_v5, 1  ;;  %v1268_v61 = vrot.slane %v2287_v23, 2  ;;  %v1044_v63 = vshrl.u32 %v2281_v34, 16 }
  0x31   : > { %1881 = vmatprep.subr.bf16.mxu0 %v1988_v1  ;;  %v913_v32 = vrot.slane %v911_v22, 1  ;;  %v1159_v22 = vrot.slane %v2100_v28, 1  ;;  %v1274_v4 = vrot.slane %v2190_v9, 1  ;;  %vm1266_vm8 = vsmask.f32 6400 }
  0x32   : > { %v2322_v58 = vsel %vm899_vm6, %v1038_v47, %v2310_v21  ;;  %v1275_v52 = vrot.slane %v2196_v25, 2  ;;  %v1161_v30 = vrot.slane %v2281_v34, 1  ;;  %v1282_v9 = vrot.slane %v1044_v63, 1  ;;  %v1979_v25 = vld [vmem:[%s2042_s22 + $0x34] ss:$0 sps:$4 sm:$0xff]   ;;  %s1950_s22 = smul.u32 80, %s2702_s16 }
  0x33   : > { %v2294_v7 = vsel %vm899_vm6, %v910_v11, %v913_v32  ;;  %v917_v45 = vor.u32 %v915_v33, %v913_v32  ;;  %v1271_v11 = vrot.slane %v2308_v54, 2  ;;  %v1278_v32 = vrot.slane %v2199_v26, 1 }
  0x34   : > { %v2338_v44 = vsel %vm1153_vm7, %v1157_v57, %v1159_v22  ;;  %v1276_v47 = vor.u32 %v1275_v52, %v1274_v4  ;;  %v2345_v28 = vsel %vm1153_vm7, %v1159_v22, %v1161_v30  ;;  %v529_v26 = vor.u32 %v528_v36, %v527_v51  ;;  %s2627_s12 = scalar_lea.vmem %s2699_s3, %s1950_s22 }
  0x35   : > { %v2315_v37 = vsel %vm899_vm6, %v917_v45, %v921_v49  ;;  %v1279_v45 = vrot.slane %v2202_v29, 2  ;;  %v1283_v49 = vrot.slane %v1040_v5, 2  ;;  %v645_v29 = vshrl.u32 %v2165_v10, 16 }
  0x36   : > { %1800 = vmatmul.mubr.msk.bf16.gmra.mxu0 %vm273_vm3, %v522_v42  ;;  %v1154_v42 = vrot.slane %v2173_v14, 1  ;;  %v1270_v14 = vrot.slane %v2302_v48, 1  ;;  %v648_v5 = vshll.u32 %v2165_v10, 16  ;;  %v530_v36 = vsel %vm511_vm5, %v2236_v59, %v529_v26 }
  0x37   : > { %1782 = vmatmul.mubr.msk.bf16.gmra.mxu1 %vm273_vm3, %v401_v55  ;;  %1803 = vmatprep.mubr.msk.bf16.mxu0 %vm1989_vm1, %v1988_v1  ;;  %v1155_v55 = vrot.slane %v2177_v17, 1  ;;  %v1269_v17 = vor.u32 %v1268_v61, %v1267_v60  ;;  %v2368_v8 = vor.u32 %v1283_v49, %v1282_v9  ;;  %v532_v10 = vrot.slane %v415_v50, 4  ;;  %v1407_v9 = vld [vmem:[%s2698_s2 + $0x18] sm:$0xff]  ;;  %v1408_v49 = vld [vmem:[%s2698_s2 + $0x20] sm:$0xff] }
  0x38   : > { %1785 = vmatprep.mubr.msk.bf16.mxu1 %vm1989_vm1, %v1988_v1  ;;  %v1272_v33 = vor.u32 %v1271_v11, %v1270_v14  ;;  %v650_v60 = vrot.slane %v648_v5, 4  ;;  %v655_v61 = vrot.slane %v2284_v35, 3  ;;  %v658_v14 = vrot.slane %v2287_v23, 4 }
  0x39   : > { %v2326_v3 = vsel %vm1153_vm7, %v1154_v42, %v1155_v55  ;;  %v2329_v19 = vsel %vm1153_vm7, %v1155_v55, %v1157_v57  ;;  %v1280_v42 = vor.u32 %v1279_v45, %v1278_v32  ;;  %v664_v11 = vrot.slane %v2302_v48, 3  ;;  %v230_v32 = vld [vmem:[%s2697_s1 + $0xc] sm:$0x3] }
  0x3a   : > { %v2366_v55 = vsel %vm1266_vm8, %v1272_v33, %v1276_v47  ;;  %v659_v50 = vor.u32 %v658_v14, %v655_v61  ;;  %v667_v22 = vrot.slane %v2308_v54, 4  ;;  %v1068_v45 = vsel %vm289_vm0, %v230_v32, 0 }
  0x3b   : > { %v2371_v13 = vsel %vm1266_vm8, %v1276_v47, %v1280_v42  ;;  %v2375_v51 = vsel %vm1266_vm8, %v1280_v42, %v2368_v8  ;;  %v1411_v42 = vld [vmem:[%s2698_s2 + $0x38] sm:$0xff]  ;;  %vm1393_vm9 = vcmask 64512   ;;  %vm1534_vm10 = vcmask 1040384  }
  0x3c   : > { %v668_v52 = vor.u32 %v667_v22, %v664_v11  ;;  %vm1536_vm11 = vcmask 58368  }
  0x3e   : > { %1804 = vmatmul.mubr.msk.bf16.gmra.mxu0 %vm273_vm3, %v526_v31  ;;  %v2358_v31 = vsel %vm1266_vm8, %v1269_v17, %v1272_v33  ;;  %v669_v33 = vsel %vm511_vm5, %v659_v50, %v668_v52  ;;  %v678_v47 = vsel %vm511_vm5, %v668_v52, %v2219_v46  ;;  %v1405_v46 = vld [vmem:[%s2698_s2 + $0x8] sm:$0xff] }
  0x3f   : > { %1786 = vmatmul.mubr.msk.bf16.gmra.mxu1 %vm273_vm3, %v410_v16  ;;  %1807 = vmatprep.mubr.msk.bf16.mxu0 %vm1989_vm1, %v1988_v1  ;;  %v418_v16 = vor.u32 %v2264_v6, %v2252_v0  ;;  %v531_v0 = vrot.slane %v412_v43, 3  ;;  %v647_v6 = vrot.slane %v645_v29, 3 }
  0x40   : > { %1789 = vmatprep.mubr.msk.bf16.mxu1 %vm1989_vm1, %v1988_v1 }
  0x41   : > { %v419_v57 = vsel %vm366_vm4, %v2234_v39, %v418_v16  ;;  %v533_v43 = vor.u32 %v532_v10, %v531_v0  ;;  %v651_v27 = vor.u32 %v650_v60, %v647_v6  ;;  %v229_v39 = vld [vmem:[%s2697_s1 + $0xa] sm:$0x3]  ;;  %v1412_v16 = vld [vmem:[%s2698_s2 + $0x40] sm:$0xff] }
  0x42   : > { %v939_v4 = vsel %vm289_vm0, %v229_v39, 0 }
  0x43   : > { %v534_v59 = vsel %vm511_vm5, %v529_v26, %v533_v43  ;;  %v660_v17 = vsel %vm511_vm5, %v651_v27, %v659_v50  ;;  %v1030_v26 = vrot.slane %v2308_v54, 1 }
  0x45   : > { %v1032_v5 = vor.u32 %v1030_v26, %v2302_v48  ;;  %v1286_v48 = vshrl.u32 %v1979_v25, 16 }
  0x46   : > { %1808 = vmatmul.mubr.msk.bf16.gmra.mxu0 %vm273_vm3, %v530_v36  ;;  %v1413_v36 = vld [vmem:[%s2698_s2 + $0x48] sm:$0xff] }
  0x47   : > { %1790 = vmatmul.mubr.msk.bf16.gmra.mxu1 %vm273_vm3, %v419_v57  ;;  %1811 = vmatprep.mubr.msk.bf16.mxu0 %vm1989_vm1, %v1988_v1 }
  0x48   : > { %1817 = vmatprep.mubr.msk.bf16.mxu1 %vm1989_vm1, %v1988_v1 }
  0x4e   : > { %1812 = vmatmul.mubr.msk.bf16.gmra.mxu0 %vm273_vm3, %v534_v59 }
  0x4f   : > { %1818 = vmatmul.mubr.msk.bf16.vlgmr.msra.gmra.mxu1 %vm273_vm3, %v660_v17  ;;  %1839 = vmatprep.mubr.msk.bf16.mxu0 %vm1989_vm1, %v1988_v1 }
  0x50   : > { %1860 = vmatpush3.bf16.msra.mxu1 %v939_v4  ;;  %1821 = vmatprep.mubr.msk.bf16.mxu1 %vm1989_vm1, %v1988_v1 }
  0x51   : > { %1903 = vmatprep.subr.bf16.mxu1 %v1988_v1 }
  0x56   : > { %1840 = vmatmul.mubr.msk.bf16.vlgmr.msra.gmra.mxu0 %vm273_vm3, %v2067_v12  ;;  %v1990_v12 = vmov 0  }
  0x57   : > { %1822 = vmatmul.mubr.msk.bf16.gmra.mxu1 %vm273_vm3, %v669_v33  ;;  %1882 = vmatpush3.bf16.msra.mxu0 %v1068_v45 }
  0x58   : > { %1825 = vmatprep.mubr.msk.bf16.mxu1 %vm1989_vm1, %v1988_v1  ;;  %1843 = vmatprep.mubr.msk.bf16.mxu0 %vm1989_vm1, %v1988_v1 }
  0x59   : > { %1925 = vmatprep.subr.bf16.mxu0 %v1988_v1  ;;  %1962 = vset.pattern.permute.xlu0 %v1990_v12 }
  0x5a   : > { %1963 = vset.pattern.permute.xlu1 %v1990_v12 }
  0x5e   : > { %1844 = vmatmul.mubr.msk.bf16.gmra.mxu0 %vm273_vm3, %v2091_v24  ;;  %v1404_v24 = vld [vmem:[%s2698_s2] sm:$0xff] }
  0x5f   : > { %1826 = vmatmul.mubr.msk.bf16.gmra.mxu1 %vm273_vm3, %v678_v47  ;;  %1847 = vmatprep.mubr.msk.bf16.mxu0 %vm1989_vm1, %v1988_v1 }
  0x60   : > { %1829 = vmatprep.mubr.msk.bf16.mxu1 %vm1989_vm1, %v1988_v1  ;;  %1416 = vperm.xlu0 %1962, %v1404_v24  }
  0x64   : > { %1421 = vperm.xlu0 %1962, %v1405_v46  }
  0x66   : > { %1848 = vmatmul.mubr.msk.bf16.gmra.mxu0 %vm273_vm3, %v2072_v15  ;;  %v1406_v15 = vld [vmem:[%s2698_s2 + $0x10] sm:$0xff] }
  0x67   : > { %1830 = vmatmul.mubr.msk.bf16.gmra.mxu1 %vm273_vm3, %v2229_v56  ;;  %1851 = vmatprep.mubr.msk.bf16.mxu0 %vm1989_vm1, %v1988_v1  ;;  %v1028_v56 = vrot.slane %v2287_v23, 1 }
  0x68   : > { %1833 = vmatprep.mubr.msk.bf16.mxu1 %vm1989_vm1, %v1988_v1  ;;  %1426 = vperm.xlu1 %1963, %v1406_v15  }
  0x69   : > { %v1029_v23 = vor.u32 %v1028_v56, %v2284_v35  ;;  %1436 = vperm.xlu0 %1962, %v1408_v49   ;;  %v1410_v35 = vld [vmem:[%s2698_s2 + $0x30] sm:$0xff] }
  0x6b   : > { %v1031_v54 = vsel %vm899_vm6, %v1029_v23, %v1030_v26 }
  0x6c   : > { %1431 = vperm.xlu1 %1963, %v1407_v9  }
  0x6d   : > { %1446 = vperm.xlu0 %1962, %v1410_v35  }
  0x6e   : > { %1852 = vmatmul.mubr.msk.bf16.gmra.mxu0 %vm273_vm3, %v2077_v18  ;;  %v231_v18 = vld [vmem:[%s2697_s1 + $0xe] sm:$0x3] }
  0x6f   : > { %1834 = vmatmul.mubr.msk.bf16.gmra.mxu1 %vm273_vm3, %v2256_v53  ;;  %1855 = vmatprep.mubr.msk.bf16.mxu0 %vm1989_vm1, %v1988_v1  ;;  %v1181_v53 = vsel %vm289_vm0, %v231_v18, 0 }
  0x70   : > { %1861 = vmatprep.mubr.msk.bf16.mxu1 %vm1989_vm1, %v1988_v1 }
  0x71   : > { %1456 = vperm.xlu0 %1962, %v1412_v16  }
  0x76   : > { %1856 = vmatmul.mubr.msk.bf16.gmra.mxu0 %vm273_vm3, %v2215_v41  ;;  %v232_v41 = vld [vmem:[%s2697_s1 + $0x10] sm:$0x3] }
  0x77   : > { %1862 = vmatmul.mubr.msk.bf16.vlgmr.msra.gmra.mxu1 %vm273_vm3, %v2245_v38  ;;  %1883 = vmatprep.mubr.msk.bf16.mxu0 %vm1989_vm1, %v1988_v1  ;;  %v1409_v38 = vld [vmem:[%s2698_s2 + $0x28] sm:$0xff]  ;;  %v1308_v29 = vsel %vm289_vm0, %v232_v41, 0 }
  0x78   : > { %1904 = vmatpush3.bf16.msra.mxu1 %v1181_v53  ;;  %1865 = vmatprep.mubr.msk.bf16.mxu1 %vm1989_vm1, %v1988_v1 }
  0x79   : > { %1441 = vperm.xlu1 %1963, %v1409_v38  }
  0x7d   : > { %1451 = vperm.xlu1 %1963, %v1411_v42  }
  0x7e   : > { %1884 = vmatmul.mubr.msk.bf16.vlgmr.msra.gmra.mxu0 %vm273_vm3, %v1031_v54 }
  0x7f   : > { %1866 = vmatmul.mubr.msk.bf16.gmra.mxu1 %vm273_vm3, %v2259_v2  ;;  %1926 = vmatpush3.bf16.msra.mxu0 %v1308_v29  ;;  %v1034_v2 = vsel %vm899_vm6, %v1032_v5, %v1033_v62  ;;  %v1048_v62 = vshll.u32 %v1979_v25, 16 }
  0x80   : > { %1869 = vmatprep.mubr.msk.bf16.mxu1 %vm1989_vm1, %v1988_v1  ;;  %1887 = vmatprep.mubr.msk.bf16.mxu0 %vm1989_vm1, %v1988_v1 }
  0x81   : > { %1461 = vperm.xlu1 %1963, %v1413_v36  }
  0x86   : > { %1888 = vmatmul.mubr.msk.bf16.gmra.mxu0 %vm273_vm3, %v1034_v2 }
  0x87   : > { %1870 = vmatmul.mubr.msk.bf16.gmra.mxu1 %vm273_vm3, %v2274_v20  ;;  %1891 = vmatprep.mubr.msk.bf16.mxu0 %vm1989_vm1, %v1988_v1  ;;  %v1046_v20 = vor.u32 %v1044_v63, %v2310_v21  ;;  %v1163_v21 = vrot.slane %v1979_v25, 1 }
  0x88   : > { %1873 = vmatprep.mubr.msk.bf16.mxu1 %vm1989_vm1, %v1988_v1 }
  0x89   : > { %v1164_v63 = vsel %vm1153_vm7, %v1161_v30, %v1163_v21 }
  0x8e   : > { %1892 = vmatmul.mubr.msk.bf16.gmra.mxu0 %vm273_vm3, %v2290_v40  ;;  %v1050_v40 = vrot.slane %v1048_v62, 1 }
  0x8f   : > { %1874 = vmatmul.mubr.msk.bf16.gmra.mxu1 %vm273_vm3, %v2294_v7  ;;  %1895 = vmatprep.mubr.msk.bf16.mxu0 %vm1989_vm1, %v1988_v1 }
  0x90   : > { %1877 = vmatprep.mubr.msk.bf16.mxu1 %vm1989_vm1, %v1988_v1  ;;  %v1051_v7 = vsel %vm899_vm6, %v1046_v20, %v1050_v40 }
  0x96   : > { %1896 = vmatmul.mubr.msk.bf16.gmra.mxu0 %vm273_vm3, %v2322_v58  ;;  %v1289_v58 = vrot.slane %v1048_v62, 2 }
  0x97   : > { %1878 = vmatmul.mubr.msk.bf16.gmra.mxu1 %vm273_vm3, %v2315_v37  ;;  %1899 = vmatprep.mubr.msk.bf16.mxu0 %vm1989_vm1, %v1988_v1  ;;  %v1288_v37 = vrot.slane %v1286_v48, 1 }
  0x98   : > { %1905 = vmatprep.mubr.msk.bf16.mxu1 %vm1989_vm1, %v1988_v1 }
  0x9e   : > { %1900 = vmatmul.mubr.msk.bf16.gmra.mxu0 %vm273_vm3, %v1051_v7 }
  0x9f   : > { %1906 = vmatmul.mubr.msk.bf16.vlgmr.msra.gmra.mxu1 %vm273_vm3, %v2326_v3  ;;  %1927 = vmatprep.mubr.msk.bf16.mxu0 %vm1989_vm1, %v1988_v1  ;;  %v1290_v3 = vor.u32 %v1289_v58, %v1288_v37 }
  0xa0   : > { %1909 = vmatprep.mubr.msk.bf16.mxu1 %vm1989_vm1, %v1988_v1 }
  0xa6   : > { %1928 = vmatmul.mubr.msk.bf16.vlgmr.msra.gmra.mxu0 %vm273_vm3, %v2358_v31 }
  0xa7   : > { %1910 = vmatmul.mubr.msk.bf16.gmra.mxu1 %vm273_vm3, %v2329_v19  ;;  %1931 = vmatprep.mubr.msk.bf16.mxu0 %vm1989_vm1, %v1988_v1  ;;  %v1291_v19 = vsel %vm1266_vm8, %v2368_v8, %v1290_v3 }
  0xa8   : > { %1913 = vmatprep.mubr.msk.bf16.mxu1 %vm1989_vm1, %v1988_v1 }
  0xae   : > { %1932 = vmatmul.mubr.msk.bf16.gmra.mxu0 %vm273_vm3, %v2366_v55 }
  0xaf   : > { %1914 = vmatmul.mubr.msk.bf16.gmra.mxu1 %vm273_vm3, %v2338_v44  ;;  %1935 = vmatprep.mubr.msk.bf16.mxu0 %vm1989_vm1, %v1988_v1 }
  0xb0   : > { %1917 = vmatprep.mubr.msk.bf16.mxu1 %vm1989_vm1, %v1988_v1 }
  0xb6   : > { %1936 = vmatmul.mubr.msk.bf16.gmra.mxu0 %vm273_vm3, %v2371_v13 }
  0xb7   : > { %1918 = vmatmul.mubr.msk.bf16.gmra.mxu1 %vm273_vm3, %v2345_v28  ;;  %1939 = vmatprep.mubr.msk.bf16.mxu0 %vm1989_vm1, %v1988_v1 }
  0xb8   : > { %1921 = vmatprep.mubr.msk.bf16.mxu1 %vm1989_vm1, %v1988_v1 }
  0xbe   : > { %1940 = vmatmul.mubr.msk.bf16.gmra.mxu0 %vm273_vm3, %v2375_v51 }
  0xbf   : > { %1922 = vmatmul.mubr.msk.bf16.gmra.mxu1 %vm273_vm3, %v1164_v63  ;;  %1943 = vmatprep.mubr.msk.bf16.mxu0 %vm1989_vm1, %v1988_v1 }
  0xc6   : > { %1944 = vmatmul.mubr.msk.bf16.gmra.mxu0 %vm273_vm3, %v1291_v19 }
  0xd6   : > { %v327_v44 = vpop.f32.mrf.mxu0 }
  0xd7   : > { %v351_v28 = vpop.f32.mrf.mxu1 }
  0xd8   : > { %v1753_v31 = vpop.f32.mrf.mxu0 }
  0xd9   : > { %v1765_v34 = vpop.f32.mrf.mxu1 }
  0xda   : > { %v330_v55 = vpop.f32.mrf.mxu0 }
  0xdb   : > { %v354_v30 = vpop.f32.mrf.mxu1 }
  0xdc   : > { %v1754_v13 = vpop.f32.mrf.mxu0 }
  0xdd   : > { %v1766_v0 = vpop.f32.mrf.mxu1 }
  0xde   : > { %v335_v51 = vpop.f32.mrf.mxu0 }
  0xdf   : > { %v359_v10 = vpop.f32.mrf.mxu1 }
  0xe0   : > { %v1757_v6 = vpop.f32.mrf.mxu0 }
  0xe1   : > { %v1769_v57 = vpop.f32.mrf.mxu1 }
  0xe2   : > { %v338_v60 = vpop.f32.mrf.mxu0 }
  0xe3   : > { %v362_v1 = vpop.f32.mrf.mxu1 }
  0xe4   : > { %v1758_v61 = vpop.f32.mrf.mxu0 }
  0xe5   : > { %v1770_v14 = vpop.f32.mrf.mxu1 }
  0xe6   : > { %v343_v43 = vpop.f32.mrf.mxu0 }
  0xe7   : > { %v472_v8 = vpop.f32.mrf.mxu1 }
  0xe8   : > { %v473_v27 = vadd.f32 %v472_v8, %v327_v44  ;;  %v1761_v50 = vpop.f32.mrf.mxu0 }
  0xe9   : > { %v1775_v39 = vpop.f32.mrf.mxu1 }
  0xea   : > { %v346_v59 = vpop.f32.mrf.mxu0 }
  0xeb   : > { %v475_v17 = vpop.f32.mrf.mxu1 }
  0xec   : > { %v476_v11 = vadd.f32 %v475_v17, %v330_v55  ;;  %v1762_v22 = vpop.f32.mrf.mxu0 }
  0xed   : > { %v1776_v4 = vpop.f32.mrf.mxu1 }
  0xee   : > { %v587_v52 = vpop.f32.mrf.mxu0 }
  0xef   : > { %v480_v32 = vpop.f32.mrf.mxu1  ;;  %v626_v33 = vadd.f32 %v587_v52, %v473_v27 }
  0xf0   : > { %v481_v45 = vadd.f32 %v480_v32, %v335_v51  ;;  %v1797_v47 = vpop.f32.mrf.mxu0 }
  0xf1   : > { %v1779_v12 = vpop.f32.mrf.mxu1 }
  0xf2   : > { %v590_v24 = vpop.f32.mrf.mxu0 }
  0xf3   : > { %v483_v15 = vpop.f32.mrf.mxu1  ;;  %v627_v46 = vadd.f32 %v590_v24, %v476_v11 }
  0xf4   : > { %v484_v18 = vadd.f32 %v483_v15, %v338_v60  ;;  %v1798_v56 = vpop.f32.mrf.mxu0 }
  0xf5   : > { %v1780_v53 = vpop.f32.mrf.mxu1 }
  0xf6   : > { %v595_v9 = vpop.f32.mrf.mxu0 }
  0xf7   : > { %v488_v49 = vpop.f32.mrf.mxu1  ;;  %v628_v23 = vadd.f32 %v595_v9, %v481_v45 }
  0xf8   : > { %v489_v26 = vadd.f32 %v488_v49, %v343_v43  ;;  %v1801_v41 = vpop.f32.mrf.mxu0 }
  0xf9   : > { %v1783_v38 = vpop.f32.mrf.mxu1 }
  0xfa   : > { %v598_v35 = vpop.f32.mrf.mxu0 }
  0xfb   : > { %v491_v54 = vpop.f32.mrf.mxu1  ;;  %v629_v29 = vadd.f32 %v598_v35, %v484_v18 }
  0xfc   : > { %v492_v42 = vadd.f32 %v491_v54, %v346_v59  ;;  %v1802_v16 = vpop.f32.mrf.mxu0 }
  0xfd   : > { %v1784_v5 = vpop.f32.mrf.mxu1 }
  0xfe   : > { %v603_v36 = vpop.f32.mrf.mxu0 }
  0xff   : > { %v496_v2 = vpop.f32.mrf.mxu1  ;;  %v630_v25 = vadd.f32 %v603_v36, %v489_v26 }
 0x100   : > { %v497_v62 = vadd.f32 %v496_v2, %v351_v28  ;;  %v1805_v20 = vpop.f32.mrf.mxu0 }
 0x101   : > { %v1787_v40 = vpop.f32.mrf.mxu1 }
 0x102   : > { %v606_v7 = vpop.f32.mrf.mxu0 }
 0x103   : > { %v499_v48 = vpop.f32.mrf.mxu1  ;;  %v631_v21 = vadd.f32 %v606_v7, %v492_v42 }
 0x104   : > { %v500_v37 = vadd.f32 %v499_v48, %v354_v30  ;;  %v1806_v58 = vpop.f32.mrf.mxu0 }
 0x105   : > { %v1788_v63 = vpop.f32.mrf.mxu1 }
 0x106   : > { %v611_v3 = vpop.f32.mrf.mxu0 }
 0x107   : > { %v504_v19 = vpop.f32.mrf.mxu1  ;;  %v632_v44 = vadd.f32 %v611_v3, %v497_v62 }
 0x108   : > { %v505_v31 = vadd.f32 %v504_v19, %v359_v10  ;;  %v1809_v34 = vpop.f32.mrf.mxu0 }
 0x109   : > { %v1791_v55 = vpop.f32.mrf.mxu1 }
 0x10a   : > { %v614_v13 = vpop.f32.mrf.mxu0 }
 0x10b   : > { %v507_v0 = vpop.f32.mrf.mxu1  ;;  %v633_v51 = vadd.f32 %v614_v13, %v500_v37 }
 0x10c   : > { %v508_v6 = vadd.f32 %v507_v0, %v362_v1  ;;  %v1810_v57 = vpop.f32.mrf.mxu0 }
 0x10d   : > { %v1792_v28 = vpop.f32.mrf.mxu1 }
 0x10e   : > { %v619_v60 = vpop.f32.mrf.mxu0 }
 0x10f   : > { %v634_v61 = vadd.f32 %v619_v60, %v505_v31  ;;  %v749_v14 = vpop.f32.mrf.mxu1 }
 0x110   : > { %v788_v43 = vadd.f32 %v749_v14, %v626_v33  ;;  %v1813_v8 = vpop.f32.mrf.mxu0 }
 0x111   : > { %v1819_v30 = vpop.f32.mrf.mxu1 }
 0x112   : > { %v622_v27 = vpop.f32.mrf.mxu0 }
 0x113   : > { %v635_v50 = vadd.f32 %v622_v27, %v508_v6  ;;  %v752_v39 = vpop.f32.mrf.mxu1 }
 0x114   : > { %v789_v59 = vadd.f32 %v752_v39, %v627_v46  ;;  %v1814_v17 = vpop.f32.mrf.mxu0 }
 0x115   : > { %v1820_v10 = vpop.f32.mrf.mxu1 }
 0x116   : > { %v847_v11 = vpop.f32.mrf.mxu0 }
 0x117   : > { %v757_v22 = vpop.f32.mrf.mxu1  ;;  %v2577_v4 = vadd.f32 %v847_v11, %v788_v43 }
 0x118   : > { %v790_v52 = vadd.f32 %v757_v22, %v628_v23  ;;  %v1841_v1 = vpop.f32.mrf.mxu0 }
 0x119   : > { %v1823_v32 = vpop.f32.mrf.mxu1 }
 0x11a   : > { %v850_v45 = vpop.f32.mrf.mxu0 }
 0x11b   : > { %v760_v47 = vpop.f32.mrf.mxu1  ;;  %v2579_v12 = vadd.f32 %v850_v45, %v789_v59 }
 0x11c   : > { %v791_v33 = vadd.f32 %v760_v47, %v629_v29  ;;  %v1842_v24 = vpop.f32.mrf.mxu0 }
 0x11d   : > { %v1824_v15 = vpop.f32.mrf.mxu1 }
 0x11e   : > { %v855_v18 = vpop.f32.mrf.mxu0 }
 0x11f   : > { %v765_v56 = vpop.f32.mrf.mxu1  ;;  %v2581_v53 = vadd.f32 %v855_v18, %v790_v52 }
 0x120   : > { %v792_v46 = vadd.f32 %v765_v56, %v630_v25  ;;  %v1845_v9 = vpop.f32.mrf.mxu0 }
 0x121   : > { %v1827_v49 = vpop.f32.mrf.mxu1 }
 0x122   : > { %v858_v26 = vpop.f32.mrf.mxu0 }
 0x123   : > { %v768_v41 = vpop.f32.mrf.mxu1  ;;  %v2583_v38 = vadd.f32 %v858_v26, %v791_v33 }
 0x124   : > { %v793_v23 = vadd.f32 %v768_v41, %v631_v21  ;;  %v1846_v35 = vpop.f32.mrf.mxu0 }
 0x125   : > { %v1828_v54 = vpop.f32.mrf.mxu1 }
 0x126   : > { %v863_v42 = vpop.f32.mrf.mxu0 }
 0x127   : > { %v773_v16 = vpop.f32.mrf.mxu1  ;;  %v2585_v5 = vadd.f32 %v863_v42, %v792_v46 }
 0x128   : > { %v794_v29 = vadd.f32 %v773_v16, %v632_v44  ;;  %v1849_v36 = vpop.f32.mrf.mxu0 }
 0x129   : > { %v1831_v2 = vpop.f32.mrf.mxu1 }
 0x12a   : > { %v866_v62 = vpop.f32.mrf.mxu0 }
 0x12b   : > { %v776_v20 = vpop.f32.mrf.mxu1  ;;  %v2587_v40 = vadd.f32 %v866_v62, %v793_v23 }
 0x12c   : > { %v795_v25 = vadd.f32 %v776_v20, %v633_v51  ;;  %v1850_v7 = vpop.f32.mrf.mxu0 }
 0x12d   : > { %v1832_v48 = vpop.f32.mrf.mxu1 }
 0x12e   : > { %v871_v37 = vpop.f32.mrf.mxu0 }
 0x12f   : > { %v781_v58 = vpop.f32.mrf.mxu1  ;;  %v2589_v63 = vadd.f32 %v871_v37, %v794_v29 }
 0x130   : > { %v796_v21 = vadd.f32 %v781_v58, %v634_v61  ;;  %v1853_v3 = vpop.f32.mrf.mxu0 }
 0x131   : > { %v1835_v19 = vpop.f32.mrf.mxu1 }
 0x132   : > { %v874_v31 = vpop.f32.mrf.mxu0 }
 0x133   : > { %v784_v34 = vpop.f32.mrf.mxu1  ;;  %v2591_v55 = vadd.f32 %v874_v31, %v795_v25  ;;  %v1417_v31 = vpop.permute.xlu0 %1416 }
 0x134   : > { %v797_v44 = vadd.f32 %v784_v34, %v635_v50  ;;  %v1854_v13 = vpop.f32.mrf.mxu0 }
 0x135   : > { %v1836_v0 = vpop.f32.mrf.mxu1 }
 0x136   : > { %v879_v6 = vpop.f32.mrf.mxu0 }
 0x137   : > { %v2593_v57 = vadd.f32 %v879_v6, %v796_v21  ;;  %v975_v51 = vpop.f32.mrf.mxu1 }
 0x138   : > { %v1857_v28 = vpop.f32.mrf.mxu0  ;;  %v1014_v48 = vadd.f32 %v975_v51, %v2577_v4 }
 0x139   : > { %v1863_v60 = vpop.f32.mrf.mxu1 }
 0x13a   : > { %v882_v14 = vpop.f32.mrf.mxu0 }
 0x13b   : > { %v2595_v43 = vadd.f32 %v882_v14, %v797_v44  ;;  %v978_v8 = vpop.f32.mrf.mxu1 }
 0x13c   : > { %v1858_v61 = vpop.f32.mrf.mxu0  ;;  %v1015_v34 = vadd.f32 %v978_v8, %v2579_v12 }
 0x13d   : > { %v1864_v30 = vpop.f32.mrf.mxu1 }
 0x13e   : > { %v1104_v27 = vpop.f32.mrf.mxu0  ;;  %v1422_v30 = vpop.permute.xlu0 %1421 }
 0x13f   : > { %v983_v39 = vpop.f32.mrf.mxu1  ;;  %v1143_v21 = vadd.f32 %v1104_v27, %v1014_v48 }
 0x140   : > { %v1885_v59 = vpop.f32.mrf.mxu0  ;;  %v1016_v60 = vadd.f32 %v983_v39, %v2581_v53 }
 0x141   : > { %v1867_v17 = vpop.f32.mrf.mxu1 }
 0x142   : > { %v1107_v10 = vpop.f32.mrf.mxu0 }
 0x143   : > { %v986_v50 = vpop.f32.mrf.mxu1  ;;  %v1144_v4 = vadd.f32 %v1107_v10, %v1015_v34 }
 0x144   : > { %v1886_v11 = vpop.f32.mrf.mxu0 }
 0x145   : > { %v1868_v22 = vpop.f32.mrf.mxu1  ;;  %v1017_v11 = vadd.f32 %v986_v50, %v2583_v38 }
 0x146   : > { %v1112_v52 = vpop.f32.mrf.mxu0 }
 0x147   : > { %v2597_v1 = vpop.f32.mrf.mxu1  ;;  %v1145_v27 = vadd.f32 %v1112_v52, %v1016_v60 }
 0x148   : > { %v1889_v32 = vpop.f32.mrf.mxu0  ;;  %v1018_v38 = vadd.f32 %v2597_v1, %v2585_v5 }
 0x149   : > { %v1871_v45 = vpop.f32.mrf.mxu1 }
 0x14a   : > { %v1115_v47 = vpop.f32.mrf.mxu0 }
 0x14b   : > { %v2599_v33 = vpop.f32.mrf.mxu1  ;;  %v1146_v39 = vadd.f32 %v1115_v47, %v1017_v11 }
 0x14c   : > { %v1890_v24 = vpop.f32.mrf.mxu0 }
 0x14d   : > { %v1872_v15 = vpop.f32.mrf.mxu1  ;;  %v1427_v24 = vpop.permute.xlu1 %1426 }
 0x14e   : > { %v2601_v18 = vpop.f32.mrf.mxu0 }
 0x14f   : > { %v2603_v56 = vpop.f32.mrf.mxu1 }
 0x150   : > { %v1893_v46 = vpop.f32.mrf.mxu0 }
 0x151   : > { %v1875_v9 = vpop.f32.mrf.mxu1 }
 0x152   : > { %v2605_v49 = vpop.f32.mrf.mxu0 }
 0x153   : > { %v2607_v26 = vpop.f32.mrf.mxu1 }
 0x154   : > { %v1894_v41 = vpop.f32.mrf.mxu0 }
 0x155   : > { %v1876_v23 = vpop.f32.mrf.mxu1 }
 0x156   : > { %v2609_v35 = vpop.f32.mrf.mxu0 }
 0x157   : > { %v2611_v54 = vpop.f32.mrf.mxu1 }
 0x158   : > { %v1897_v42 = vpop.f32.mrf.mxu0 }
 0x159   : > { %v1879_v16 = vpop.f32.mrf.mxu1 }
 0x15a   : > { %v2613_v29 = vpop.f32.mrf.mxu0 }
 0x15b   : > { %v2615_v36 = vpop.f32.mrf.mxu1 }
 0x15c   : > { %v1898_v2 = vpop.f32.mrf.mxu0 }
 0x15d   : > { %v1880_v62 = vpop.f32.mrf.mxu1 }
 0x15e   : > { %v2617_v20 = vpop.f32.mrf.mxu0 }
 0x15f   : > { %v1217_v25 = vpop.f32.mrf.mxu1 }
 0x160   : > { %v1901_v7 = vpop.f32.mrf.mxu0  ;;  %v1256_v44 = vadd.f32 %v1217_v25, %v1143_v21 }
 0x161   : > { %v1907_v37 = vpop.f32.mrf.mxu1 }
 0x162   : > { %v2620_v58 = vpop.f32.mrf.mxu0  ;;  %v1147_v37 = vadd.f32 %v2601_v18, %v1018_v38 }
 0x163   : > { %v1220_v3 = vpop.f32.mrf.mxu1 }
 0x164   : > { %v1902_v19 = vpop.f32.mrf.mxu0  ;;  %v1257_v14 = vadd.f32 %v1220_v3, %v1144_v4 }
 0x165   : > { %v1908_v13 = vpop.f32.mrf.mxu1 }
 0x166   : > { %v1344_v0 = vpop.f32.mrf.mxu0 }
 0x167   : > { %v1225_v6 = vpop.f32.mrf.mxu1  ;;  %v1383_v51 = vadd.f32 %v1344_v0, %v1256_v44  ;;  %v1019_v44 = vadd.f32 %v2599_v33, %v2587_v40  ;;  %v1020_v33 = vadd.f32 %v2603_v56, %v2589_v63  ;;  %v1021_v56 = vadd.f32 %v2607_v26, %v2591_v55 }
 0x168   : > { %v1929_v28 = vpop.f32.mrf.mxu0  ;;  %v1258_v10 = vadd.f32 %v1225_v6, %v1145_v27  ;;  %v1022_v26 = vadd.f32 %v2611_v54, %v2593_v57  ;;  %v1023_v54 = vadd.f32 %v2615_v36, %v2595_v43 }
 0x169   : > { %1394 = vst.msk [vmem:[%s2627_s12] sm:$0xff] %vm1393_vm9, %v1383_v51  ;;  %v1464_v12 = vmul.f32 %v1417_v31, %v1383_v51  ;;  %v1911_v8 = vpop.f32.mrf.mxu1  ;;  %v1432_v31 = vpop.permute.xlu1 %1431  ;;  %v1148_v28 = vadd.f32 %v2605_v49, %v1019_v44  ;;  %v1150_v38 = vadd.f32 %v2613_v29, %v1021_v56 }
 0x16a   : > { %v1347_v61 = vpop.f32.mrf.mxu0 }
 0x16b   : > { %v1228_v59 = vpop.f32.mrf.mxu1  ;;  %v1384_v17 = vadd.f32 %v1347_v61, %v1257_v14  ;;  %v1499_v32 = vmul.f32 %v1464_v12, %v1383_v51  ;;  %v1474_v46 = vsel %vm1393_vm9, %v1464_v12, 0.0  ;;  %v1437_v61 = vpop.permute.xlu0 %1436 }
 0x16c   : > { %v1930_v22 = vpop.f32.mrf.mxu0  ;;  %v1259_v2 = vadd.f32 %v1228_v59, %v1146_v39 }
 0x16d   : > { %1395 = vst.msk [vmem:[%s2627_s12 + $0x8] sm:$0xff] %vm1393_vm9, %v1384_v17  ;;  %v1465_v45 = vmul.f32 %v1422_v30, %v1384_v17  ;;  %v1912_v53 = vpop.f32.mrf.mxu1  ;;  %v1509_v16 = vsel %vm1393_vm9, %v1499_v32, 0.0 }
 0x16e   : > { %v1352_v15 = vpop.f32.mrf.mxu0 }
 0x16f   : > { %v1475_v9 = vsel %vm1393_vm9, %v1465_v45, 0.0  ;;  %v1500_v52 = vmul.f32 %v1465_v45, %v1384_v17  ;;  %v1233_v41 = vpop.f32.mrf.mxu1  ;;  %v1385_v23 = vadd.f32 %v1352_v15, %v1258_v10  ;;  %v1149_v10 = vadd.f32 %v2609_v35, %v1020_v33 }
 0x170   : > { %v1476_v50 = vadd.f32 %v1475_v9, %v1474_v46  ;;  %v1933_v42 = vpop.f32.mrf.mxu0  ;;  %v1260_v13 = vadd.f32 %v1233_v41, %v1147_v37 }
 0x171   : > { %v1510_v62 = vsel %vm1393_vm9, %v1500_v52, 0.0  ;;  %1396 = vst.msk [vmem:[%s2627_s12 + $0x10] sm:$0xff] %vm1393_vm9, %v1385_v23  ;;  %v1466_v47 = vmul.f32 %v1427_v24, %v1385_v23  ;;  %v1915_v25 = vpop.f32.mrf.mxu1  ;;  %v1442_v24 = vpop.permute.xlu1 %1441 }
 0x172   : > { %v1511_v7 = vadd.f32 %v1510_v62, %v1509_v16  ;;  %v1355_v48 = vpop.f32.mrf.mxu0  ;;  %v1447_v62 = vpop.permute.xlu0 %1446 }
 0x173   : > { %v1477_v21 = vsel %vm1393_vm9, %v1466_v47, 0.0  ;;  %v1501_v3 = vmul.f32 %v1466_v47, %v1385_v23  ;;  %v1236_v5 = vpop.f32.mrf.mxu1  ;;  %v1386_v1 = vadd.f32 %v1355_v48, %v1259_v2 }
 0x174   : > { %v1478_v19 = vadd.f32 %v1477_v21, %v1476_v50  ;;  %v1934_v34 = vpop.f32.mrf.mxu0  ;;  %v1261_v27 = vadd.f32 %v1236_v5, %v1148_v28 }
 0x175   : > { %v1512_v0 = vsel %vm1393_vm9, %v1501_v3, 0.0  ;;  %1397 = vst.msk [vmem:[%s2627_s12 + $0x18] sm:$0xff] %vm1393_vm9, %v1386_v1  ;;  %v1467_v4 = vmul.f32 %v1432_v31, %v1386_v1  ;;  %v1916_v6 = vpop.f32.mrf.mxu1  ;;  %v1151_v3 = vadd.f32 %v2617_v20, %v1022_v26  ;;  %v1452_v34 = vpop.permute.xlu1 %1451 }
 0x176   : > { %v1513_v18 = vadd.f32 %v1512_v0, %v1511_v7  ;;  %v1360_v51 = vpop.f32.mrf.mxu0 }
 0x177   : > { %v1479_v60 = vsel %vm1393_vm9, %v1467_v4, 0.0  ;;  %v1502_v14 = vmul.f32 %v1467_v4, %v1386_v1  ;;  %v1241_v12 = vpop.f32.mrf.mxu1  ;;  %v1387_v8 = vadd.f32 %v1360_v51, %v1260_v13  ;;  %v1152_v51 = vadd.f32 %v2620_v58, %v1023_v54 }
 0x178   : > { %v1480_v30 = vadd.f32 %v1479_v60, %v1478_v19  ;;  %v1937_v40 = vpop.f32.mrf.mxu0  ;;  %v1262_v46 = vadd.f32 %v1241_v12, %v1149_v10  ;;  %v1457_v12 = vpop.permute.xlu0 %1456 }
 0x179   : > { %v1514_v59 = vsel %vm1393_vm9, %v1502_v14, 0.0  ;;  %1398 = vst.msk [vmem:[%s2627_s12 + $0x20] sm:$0xff] %vm1393_vm9, %v1387_v8  ;;  %v1468_v17 = vmul.f32 %v1437_v61, %v1387_v8  ;;  %v1919_v11 = vpop.f32.mrf.mxu1 }
 0x17a   : > { %v1515_v49 = vadd.f32 %v1514_v59, %v1513_v18  ;;  %v1363_v22 = vpop.f32.mrf.mxu0 }
 0x17b   : > { %v1481_v32 = vsel %vm1393_vm9, %v1468_v17, 0.0  ;;  %v1503_v45 = vmul.f32 %v1468_v17, %v1387_v8  ;;  %v1244_v53 = vpop.f32.mrf.mxu1  ;;  %v1388_v39 = vadd.f32 %v1363_v22, %v1261_v27  ;;  %v1462_v17 = vpop.permute.xlu1 %1461 }
 0x17c   : > { %v1482_v15 = vadd.f32 %v1481_v32, %v1480_v30  ;;  %v1938_v63 = vpop.f32.mrf.mxu0  ;;  %v1263_v25 = vadd.f32 %v1244_v53, %v1150_v38 }
 0x17d   : > { %v1516_v9 = vsel %vm1393_vm9, %v1503_v45, 0.0  ;;  %1399 = vst.msk [vmem:[%s2627_s12 + $0x28] sm:$0xff] %vm1393_vm9, %v1388_v39  ;;  %v1469_v52 = vmul.f32 %v1442_v24, %v1388_v39  ;;  %v1920_v41 = vpop.f32.mrf.mxu1 }
 0x17e   : > { %v1517_v35 = vadd.f32 %v1516_v9, %v1515_v49  ;;  %v1368_v23 = vpop.f32.mrf.mxu0 }
 0x17f   : > { %v1483_v50 = vsel %vm1393_vm9, %v1469_v52, 0.0  ;;  %v1504_v42 = vmul.f32 %v1469_v52, %v1388_v39  ;;  %v1249_v16 = vpop.f32.mrf.mxu1  ;;  %v1389_v2 = vadd.f32 %v1368_v23, %v1262_v46 }
 0x180   : > { %v1484_v47 = vadd.f32 %v1483_v50, %v1482_v15  ;;  %v1941_v55 = vpop.f32.mrf.mxu0  ;;  %v1264_v13 = vadd.f32 %v1249_v16, %v1151_v3 }
 0x181   : > { %v1518_v7 = vsel %vm1393_vm9, %v1504_v42, 0.0  ;;  %1400 = vst.msk [vmem:[%s2627_s12 + $0x30] sm:$0xff] %vm1393_vm9, %v1389_v2  ;;  %v1470_v48 = vmul.f32 %v1447_v62, %v1389_v2  ;;  %v1923_v37 = vpop.f32.mrf.mxu1 }
 0x182   : > { %v1519_v29 = vadd.f32 %v1518_v7, %v1517_v35  ;;  %v1371_v21 = vpop.f32.mrf.mxu0 }
 0x183   : > { %v1485_v5 = vsel %vm1393_vm9, %v1470_v48, 0.0  ;;  %v1505_v1 = vmul.f32 %v1470_v48, %v1389_v2  ;;  %v1252_v19 = vpop.f32.mrf.mxu1  ;;  %v1390_v31 = vadd.f32 %v1371_v21, %v1263_v25 }
 0x184   : > { %v1486_v44 = vadd.f32 %v1485_v5, %v1484_v47  ;;  %v1942_v57 = vpop.f32.mrf.mxu0  ;;  %v1265_v36 = vadd.f32 %v1252_v19, %v1152_v51 }
 0x185   : > { %v1520_v0 = vsel %vm1393_vm9, %v1505_v1, 0.0  ;;  %1401 = vst.msk [vmem:[%s2627_s12 + $0x38] sm:$0xff] %vm1393_vm9, %v1390_v31  ;;  %v1471_v4 = vmul.f32 %v1452_v34, %v1390_v31  ;;  %v1924_v6 = vpop.f32.mrf.mxu1 }
 0x186   : > { %v1521_v20 = vadd.f32 %v1520_v0, %v1519_v29  ;;  %v1376_v18 = vpop.f32.mrf.mxu0 }
 0x187   : > { %v1487_v28 = vsel %vm1393_vm9, %v1471_v4, 0.0  ;;  %v1506_v60 = vmul.f32 %v1471_v4, %v1390_v31  ;;  %v1391_v14 = vadd.f32 %v1376_v18, %v1264_v13 }
 0x188   : > { %v1488_v8 = vadd.f32 %v1487_v28, %v1486_v44  ;;  %v1945_v43 = vpop.f32.mrf.mxu0 }
 0x189   : > { %v1522_v61 = vsel %vm1393_vm9, %v1506_v60, 0.0  ;;  %1402 = vst.msk [vmem:[%s2627_s12 + $0x40] sm:$0xff] %vm1393_vm9, %v1391_v14  ;;  %v1472_v30 = vmul.f32 %v1457_v12, %v1391_v14 }
 0x18a   : > { %v1523_v40 = vadd.f32 %v1522_v61, %v1521_v20  ;;  %v1379_v33 = vpop.f32.mrf.mxu0 }
 0x18b   : > { %v1489_v27 = vsel %vm1393_vm9, %v1472_v30, 0.0  ;;  %v1507_v59 = vmul.f32 %v1472_v30, %v1391_v14  ;;  %v1392_v58 = vadd.f32 %v1379_v33, %v1265_v36 }
 0x18c   : > { %v1490_v11 = vadd.f32 %v1489_v27, %v1488_v8  ;;  %v1946_v49 = vpop.f32.mrf.mxu0 }
 0x18d   : > { %v1524_v22 = vsel %vm1393_vm9, %v1507_v59, 0.0  ;;  %1403 = vst.msk [vmem:[%s2627_s12 + $0x48] sm:$0xff] %vm1393_vm9, %v1392_v58  ;;  %v1473_v10 = vmul.f32 %v1462_v17, %v1392_v58 }
 0x18e   : > { %v1525_v32 = vadd.f32 %v1524_v22, %v1523_v40 }
 0x18f   : > { %v1491_v45 = vsel %vm1393_vm9, %v1473_v10, 0.0  ;;  %v1508_v53 = vmul.f32 %v1473_v10, %v1392_v58 }
 0x190   : > { %v1492_v39 = vadd.f32 %v1491_v45, %v1490_v11 }
 0x191   : > { %v1526_v24 = vsel %vm1393_vm9, %v1508_v53, 0.0 }
 0x192   : > { %v1493_v15 = vrot.slane %v1492_v39, 4  ;;  %v1527_v63 = vadd.f32 %v1526_v24, %v1525_v32 }
 0x194   : > { %v1494_v56 = vadd.f32 %v1493_v15, %v1492_v39  ;;  %v1528_v46 = vrot.slane %v1527_v63, 4 }
 0x196   : > { %v1495_v9 = vrot.slane %v1494_v56, 2  ;;  %v1529_v52 = vadd.f32 %v1528_v46, %v1527_v63 }
 0x198   : > { %v1496_v41 = vadd.f32 %v1495_v9, %v1494_v56  ;;  %v1530_v35 = vrot.slane %v1529_v52, 2 }
 0x19a   : > { %v1497_v23 = vrot.slane %v1496_v41, 1  ;;  %v1531_v38 = vadd.f32 %v1530_v35, %v1529_v52 }
 0x19c   : > { %v1532_v50 = vrot.slane %v1531_v38, 1  ;;  %v1498_v42 = vadd.f32 %v1497_v23, %v1496_v41 }
 0x19e   : > { %v1533_v16 = vadd.f32 %v1532_v50, %v1531_v38 }
 0x1a0   : > { %v1535_v2 = vsel %vm1534_vm10, %v1498_v42, %v1533_v16 }
 0x1a1   : > { %1537 = vst.msk [vmem:[%s208_s18] sm:$0x3] %vm1536_vm11, %v1535_v2 }
 0x1a2 PF: > { %s15_s15 = sadd.s32 1, %s1986_s15  }
 0x1a3   : > { %p12_p4 = scmp.ge.s32.totalorder %s15_s15, 4  }
 0x1a5   :  { %14 = sbr.rel (!%p12_p4) target bundleno = 1 (0x1), region = 74 }

// kernel: down_forward.4
= control target key start
LH: loop header
LB: loop body
LE: loop exit
PB: predicated region body
PF: predicated region fallthrough
CT: control target
= control target key end

     0   :  { %s2019_s21 = smov 0   ;;  %s2663_s0 = inlined_call_operand.vmem [shape: f32[2,80,8], index: 0, kind: input, shape index: {}]   ;;  %s2664_s1 = inlined_call_operand.vmem [shape: f32[1,8], index: 1, kind: input, shape index: {}]   ;;  %s2665_s2 = inlined_call_operand.vmem [shape: f32[1,8], index: 2, kind: input, shape index: {}]   ;;  %s2666_s3 = inlined_call_operand.vmem [shape: bf16[9,8,8], index: 3, kind: input, shape index: {}]   ;;  %s2667_s4 = inlined_call_operand.vmem [shape: f32[80,1], index: 4, kind: input, shape index: {}]   ;;  %s2668_s5 = inlined_call_operand.vmem [shape: f32[2,80,8], index: 5, kind: output, shape index: {0}]   ;;  %s2669_s6 = inlined_call_operand.vmem [shape: f32[2,2,8], index: 6, kind: output, shape index: {1}]  }
   0x1 LB: > { %s1648_s22 = sadd.s32 4294967295, %s1979_s21   ;;  %p1652_p0 = scmp.ge.s32.totalorder %s1979_s21, 1  ;;  %s1979_s21 = sphi %s2019_s21, %s17_s21  }
   0x2   : > { %p215_p1 = scmp.lt.s32.totalorder %s1979_s21, 3 }
   0x4   : > { %p216_p2 = pnand %p1652_p0, %p215_p1 }
   0x5   : > { %p249_p3 = scmp.lt.s32.totalorder (!%p216_p2), %s1648_s22, 1 }
   0x6   : > { %219 = sbr.rel (%p216_p2) target bundleno = 544 (0x220), region = 40 }
   0xb   : > { %v268_v0 = vld [vmem:[%s2667_s4 + $0x20] sm:$0xff]  ;;  %v1981_v2 = vmov 0   ;;  %v269_v3 = vld [vmem:[%s2667_s4 + $0x28] sm:$0xff]  ;;  %vm436_vm0 = vcmask 1043456   ;;  %v1982_v6 = vmov 0.0   ;;  %v271_v8 = vld [vmem:[%s2667_s4 + $0x38] sm:$0xff] }
   0xc   : > { %v264_v1 = vld [vmem:[%s2667_s4] sm:$0xff]  ;;  %1972 = vset.pattern.permute.xlu1 %v1981_v2  ;;  %1971 = vset.pattern.permute.xlu0 %v1981_v2  ;;  %v265_v4 = vld [vmem:[%s2667_s4 + $0x8] sm:$0xff]  ;;  %v270_v9 = vld [vmem:[%s2667_s4 + $0x30] sm:$0xff]  ;;  %vm1983_vm1 = vmmov 0   ;;  %v2072_v14 = vrot.slane %v1981_v2, 4  ;;  %v2075_v15 = vrot.slane %v1981_v2, 5 }
   0xd   : > { %350 = vperm.xlu1 %1972, %v268_v0   ;;  %330 = vperm.xlu0 %1971, %v264_v1   ;;  %v394_v5 = vld [vmem:[%s2666_s3 + $0x4] sm:$0xf]  ;;  %v267_v10 = vld [vmem:[%s2667_s4 + $0x18] sm:$0xff]  ;;  %v266_v11 = vld [vmem:[%s2667_s4 + $0x10] sm:$0xff]  ;;  %s2671_s22 = smov (!%p249_p3, %s1648_s22), 1  ;;  %vm408_vm2 = vcmask 1044480  }
   0xe   : > { %1759 = vmatprep.subr.bf16.mxu0 %v1982_v6  ;;  %v438_v7 = vsel %vm436_vm0, %v394_v5, 0  ;;  %1957 = vmatprep.subr.bf16.mxu1 %v1982_v6  ;;  %v273_v12 = vld [vmem:[%s2667_s4 + $0x48] sm:$0xff]  ;;  %v272_v13 = vld [vmem:[%s2667_s4 + $0x40] sm:$0xff]  ;;  %v1137_v16 = vor.u32 %v2075_v15, %v2072_v14  ;;  %s1959_s23 = smul.u32 80, %s2671_s22  ;;  %v2128_v0 = vrot.slane %v1981_v2, 3  ;;  %vm420_vm3 = vcmask 64512  }
   0xf   : > { %1760 = vmatpush3.bf16.msra.mxu0 %v438_v7  ;;  %1958 = vmatpush3.bf16.msra.mxu1 %v438_v7  ;;  %v1656_v17 = vld [vmem:[%s2664_s1] ss:$0 sm:$0xff]  ;;  %v395_v1 = vld [vmem:[%s2666_s3 + $0x8] sm:$0xf]  ;;  %vm513_vm4 = vsmask.f32 5376 }
  0x10   : > { %1803 = vmatprep.subr.bf16.mxu0 %v1982_v6  ;;  %1781 = vmatprep.subr.bf16.mxu1 %v1982_v6  ;;  %s2091_s26 = scalar_lea.vmem %s2663_s0, %s1959_s23  ;;  %v1657_v24 = vld [vmem:[%s2665_s2] ss:$0 sm:$0xff]  ;;  %vm658_vm5 = vsmask.f32 4352  ;;  %vm997_vm6 = vsmask.f32 7424  ;;  %s2585_s28 = scalar_lea.vmem %s2668_s5, %s1959_s23 }
  0x11   : > { %355 = vperm.xlu1 %1972, %v269_v3   ;;  %335 = vperm.xlu0 %1971, %v265_v4   ;;  %v274_v18 = vld [vmem:[%s2091_s26] sm:$0xff]  ;;  %v275_v19 = vld [vmem:[%s2091_s26 + $0x8] sm:$0xff]  ;;  %v281_v26 = vld [vmem:[%s2091_s26 + $0x38] sm:$0xff]  ;;  %vm1115_vm7 = vsmask.f32 3328  ;;  %vm1240_vm10 = vcmask 1042432  }
  0x12   : > { %1761 = vmatprep.mubr.msk.bf16.mxu0 %vm1983_vm1, %v1982_v6  ;;  %1773 = vmatprep.mubr.msk.bf16.mxu1 %vm1983_vm1, %v1982_v6  ;;  %v279_v20 = vld [vmem:[%s2091_s26 + $0x28] sm:$0xff]  ;;  %v278_v21 = vld [vmem:[%s2091_s26 + $0x20] sm:$0xff]  ;;  %v291_v22 = vmul.f32 %v1656_v17, %v274_v18  ;;  %v292_v23 = vmul.f32 %v1656_v17, %v275_v19  ;;  %v280_v27 = vld [vmem:[%s2091_s26 + $0x30] sm:$0xff]  ;;  %v298_v34 = vmul.f32 %v1656_v17, %v281_v26  ;;  %vm1353_vm8 = vsmask.f32 2304  ;;  %s1655_s23 = sshll.u32 %s2671_s22, 1 }
  0x13   : > { %v296_v25 = vmul.f32 %v1656_v17, %v279_v20  ;;  %v295_v28 = vmul.f32 %v1656_v17, %v278_v21  ;;  %v277_v31 = vld [vmem:[%s2091_s26 + $0x18] sm:$0xff]  ;;  %v276_v32 = vld [vmem:[%s2091_s26 + $0x10] sm:$0xff]  ;;  %v297_v35 = vmul.f32 %v1656_v17, %v280_v27  ;;  %v283_v46 = vld [vmem:[%s2091_s26 + $0x48] sm:$0xff]  ;;  %vm783_vm9 = vsmask.f32 256  ;;  %s262_s7 = scalar_lea.vmem %s2669_s6, %s1655_s23 }
  0x14   : > { %v308_v29 = vadd.f32 %v1657_v24, %v291_v22  ;;  %v309_v30 = vadd.f32 %v1657_v24, %v292_v23  ;;  %v294_v39 = vmul.f32 %v1656_v17, %v277_v31  ;;  %v293_v40 = vmul.f32 %v1656_v17, %v276_v32  ;;  %v282_v47 = vld [vmem:[%s2091_s26 + $0x40] sm:$0xff] }
  0x15   : > { %365 = vperm.xlu1 %1972, %v271_v8   ;;  %360 = vperm.xlu0 %1971, %v270_v9   ;;  %v313_v33 = vadd.f32 %v1657_v24, %v296_v25  ;;  %v312_v37 = vadd.f32 %v1657_v24, %v295_v28  ;;  %v315_v44 = vadd.f32 %v1657_v24, %v298_v34  ;;  %v393_v20 = vld [vmem:[%s2666_s3] sm:$0xf]  ;;  %vm1558_vm11 = vcmask 1040384  }
  0x16   : > { %v318_v41 = vmax.f32 %v308_v29, 0.0  ;;  %v319_v42 = vmax.f32 %v309_v30, 0.0  ;;  %v314_v45 = vadd.f32 %v1657_v24, %v297_v35  ;;  %v311_v51 = vadd.f32 %v1657_v24, %v294_v39 }
  0x17   : > { %v323_v43 = vmax.f32 %v313_v33, 0.0  ;;  %v322_v48 = vmax.f32 %v312_v37, 0.0  ;;  %v310_v52 = vadd.f32 %v1657_v24, %v293_v40  ;;  %v300_v55 = vmul.f32 %v1656_v17, %v283_v46 }
  0x18   : > { %v299_v56 = vmul.f32 %v1656_v17, %v282_v47  ;;  %v325_v58 = vmax.f32 %v315_v44, 0.0  ;;  %v324_v59 = vmax.f32 %v314_v45, 0.0  ;;  %v321_v3 = vmax.f32 %v311_v51, 0.0  ;;  %v396_v47 = vld [vmem:[%s2666_s3 + $0xc] sm:$0xf] }
  0x19   : > { %345 = vperm.xlu1 %1972, %v267_v10   ;;  %340 = vperm.xlu0 %1971, %v266_v11   ;;  %v320_v4 = vmax.f32 %v310_v52, 0.0  ;;  %v317_v5 = vadd.f32 %v1657_v24, %v300_v55  ;;  %v583_v29 = vsel %vm436_vm0, %v393_v20, 0  ;;  %v517_v39 = vrot.slane %v1981_v2, 2 }
  0x1a   : > { %v316_v7 = vadd.f32 %v1657_v24, %v299_v56  ;;  %v661_v55 = vor.u32 %v2072_v14, %v2128_v0  ;;  %vm1560_vm12 = vcmask 58368  }
  0x1b   : > { %v327_v23 = vmax.f32 %v317_v5, 0.0 }
  0x1c   : > { %v326_v24 = vmax.f32 %v316_v7, 0.0 }
  0x1d   : > { %375 = vperm.xlu1 %1972, %v273_v12   ;;  %370 = vperm.xlu0 %1971, %v272_v13   ;;  %v698_v12 = vsel %vm436_vm0, %v395_v1, 0  ;;  %v1012_v1 = vrot.slane %v1981_v2, 1 }
  0x88   : > { %v2107_v36 = vpop.permute.xlu1 %350  ;;  %v2109_v38 = vpop.permute.xlu0 %330 }
  0x89   : > { %v378_v53 = vmul.f32 %v2109_v38, %v318_v41  ;;  %v382_v61 = vmul.f32 %v2107_v36, %v322_v48 }
  0x8c   : > { %v2113_v49 = vpop.permute.xlu1 %355  ;;  %v2115_v50 = vpop.permute.xlu0 %335 }
  0x8d   : > { %v379_v54 = vmul.f32 %v2115_v50, %v319_v42  ;;  %v383_v57 = vmul.f32 %v2113_v49, %v323_v43 }
  0x8f   : > { %v2120_v60 = vpack.c.bf16 %v379_v54, %v378_v53  ;;  %v2133_v8 = vpack.c.bf16 %v383_v57, %v382_v61  ;;  %v397_v53 = vld [vmem:[%s2666_s3 + $0x10] sm:$0xf]  ;;  %v521_v54 = vor.u32 %v517_v39, %v2128_v0 }
  0x90   : > { %v2123_v62 = vpop.permute.xlu1 %365  ;;  %v2125_v63 = vpop.permute.xlu0 %360 }
  0x91   : > { %v385_v9 = vmul.f32 %v2123_v62, %v325_v58  ;;  %v384_v10 = vmul.f32 %v2125_v63, %v324_v59  ;;  %v410_v11 = vrot.slane %v2120_v60, 3  ;;  %v414_v25 = vrot.slane %v2133_v8, 3 }
  0x92   : > { %v2158_v27 = vshrl.u32 %v2120_v60, 16  ;;  %v2165_v30 = vshll.u32 %v2120_v60, 16  ;;  %v816_v58 = vsel %vm436_vm0, %v396_v47, 0  ;;  %v2214_v59 = vshrl.u32 %v2133_v8, 16 }
  0x93   : > { %v2139_v13 = vpack.c.bf16 %v385_v9, %v384_v10  ;;  %v411_v19 = vsel %vm408_vm2, %v2128_v0, %v410_v11  ;;  %v2217_v61 = vshll.u32 %v2133_v8, 16  ;;  %v912_v0 = vsel %vm436_vm0, %v397_v53, 0 }
  0x94   : > { %v2141_v17 = vpop.permute.xlu1 %345  ;;  %v2143_v18 = vpop.permute.xlu0 %340  ;;  %1762 = vmatmul.mubr.msk.bf16.vlgmr.msra.gmra.mxu0 %vm420_vm3, %v411_v19  ;;  %v525_v41 = vrot.slane %v2158_v27, 2  ;;  %v528_v43 = vrot.slane %v2165_v30, 3  ;;  %v662_v44 = vrot.slane %v2158_v27, 3  ;;  %v663_v45 = vrot.slane %v2165_v30, 4 }
  0x95   : > { %v381_v21 = vmul.f32 %v2141_v17, %v321_v3  ;;  %v380_v22 = vmul.f32 %v2143_v18, %v320_v4  ;;  %1804 = vmatpush3.bf16.msra.mxu0 %v698_v12  ;;  %v416_v26 = vrot.slane %v2139_v13, 3  ;;  %1765 = vmatprep.mubr.msk.bf16.mxu0 %vm1983_vm1, %v1982_v6  ;;  %v2224_v3 = vshrl.u32 %v2139_v13, 16 }
  0x96   : > { %1847 = vmatprep.subr.bf16.mxu0 %v1982_v6  ;;  %v2207_v56 = vor.u32 %v528_v43, %v525_v41  ;;  %v2209_v57 = vor.u32 %v663_v45, %v662_v44  ;;  %v2227_v4 = vshll.u32 %v2139_v13, 16  ;;  %v998_v12 = vrot.slane %v2165_v30, 1 }
  0x97   : > { %v2160_v28 = vpack.c.bf16 %v381_v21, %v380_v22  ;;  %v417_v33 = vsel %vm408_vm2, %v414_v25, %v416_v26  ;;  %v1116_v22 = vrot.slane %v2158_v27, 4  ;;  %v1003_v41 = vrot.slane %v2217_v61, 1 }
  0x98   : > { %v2167_v31 = vpop.permute.xlu1 %375  ;;  %v2169_v32 = vpop.permute.xlu0 %370  ;;  %1774 = vmatmul.mubr.msk.bf16.vlgmr.msra.gmra.mxu1 %vm420_vm3, %v417_v33  ;;  %v530_v10 = vsel %vm513_vm4, %v521_v54, %v2207_v56  ;;  %v1124_v44 = vrot.slane %v2217_v61, 5  ;;  %v1006_v45 = vrot.slane %v2227_v4, 1  ;;  %v1128_v53 = vrot.slane %v2227_v4, 5 }
  0x99   : > { %v387_v34 = vmul.f32 %v2167_v31, %v327_v23  ;;  %v386_v35 = vmul.f32 %v2169_v32, %v326_v24  ;;  %1782 = vmatpush3.bf16.msra.mxu1 %v583_v29  ;;  %v412_v37 = vrot.slane %v2160_v28, 3  ;;  %1777 = vmatprep.mubr.msk.bf16.mxu1 %vm1983_vm1, %v1982_v6  ;;  %v2195_v48 = vshrl.u32 %v2160_v28, 16 }
  0x9a   : > { %1825 = vmatprep.subr.bf16.mxu1 %v1982_v6  ;;  %v2198_v51 = vshll.u32 %v2160_v28, 16  ;;  %v1366_v14 = vrot.slane %v2227_v4, 6 }
  0x9b   : > { %v2179_v40 = vpack.c.bf16 %v387_v34, %v386_v35  ;;  %v413_v42 = vsel %vm408_vm2, %v410_v11, %v412_v37  ;;  %v534_v5 = vrot.slane %v2195_v48, 2  ;;  %v415_v9 = vsel %vm408_vm2, %v412_v37, %v414_v25 }
  0x9c   : > { %1766 = vmatmul.mubr.msk.bf16.gmra.mxu0 %vm420_vm3, %v413_v42  ;;  %v537_v7 = vrot.slane %v2198_v51, 3  ;;  %v665_v11 = vsel %vm658_vm5, %v661_v55, %v2209_v57  ;;  %v666_v19 = vrot.slane %v2195_v48, 3  ;;  %v667_v20 = vrot.slane %v2198_v51, 4 }
  0x9d   : > { %v418_v46 = vrot.slane %v2179_v40, 3  ;;  %1769 = vmatprep.mubr.msk.bf16.mxu0 %vm1983_vm1, %v1982_v6  ;;  %v1000_v21 = vrot.slane %v2198_v51, 1  ;;  %v2243_v23 = vshrl.u32 %v2179_v40, 16  ;;  %v2246_v24 = vshll.u32 %v2179_v40, 16 }
  0x9e   : > { %v999_v25 = vor.u32 %v998_v12, %v2158_v27  ;;  %v2252_v29 = vor.u32 %v537_v7, %v534_v5  ;;  %v1119_v33 = vrot.slane %v2195_v48, 4  ;;  %v1120_v34 = vrot.slane %v2198_v51, 5 }
  0x9f   : > { %v419_v52 = vsel %vm408_vm2, %v416_v26, %v418_v46  ;;  %v1117_v26 = vrot.slane %v2165_v30, 5  ;;  %v1002_v35 = vor.u32 %v1000_v21, %v2195_v48  ;;  %v1123_v42 = vrot.slane %v2214_v59, 4 }
  0xa0   : > { %1778 = vmatmul.mubr.msk.bf16.gmra.mxu1 %vm420_vm3, %v419_v52  ;;  %v2258_v37 = vsel %vm997_vm6, %v999_v25, %v1000_v21  ;;  %v1121_v43 = vor.u32 %v1120_v34, %v1119_v33  ;;  %v1127_v46 = vrot.slane %v2224_v3, 4  ;;  %v1005_v52 = vor.u32 %v1003_v41, %v2214_v59 }
  0xa1   : > { %1783 = vmatprep.mubr.msk.bf16.mxu1 %vm1983_vm1, %v1982_v6  ;;  %v1118_v39 = vor.u32 %v1117_v26, %v1116_v22  ;;  %v2269_v47 = vsel %vm997_vm6, %v1002_v35, %v1003_v41  ;;  %v1009_v54 = vrot.slane %v2246_v24, 1  ;;  %v1125_v5 = vor.u32 %v1124_v44, %v1123_v42 }
  0xa2   : > { %v1131_v7 = vrot.slane %v2243_v23, 4  ;;  %v1132_v12 = vrot.slane %v2246_v24, 5  ;;  %v543_v22 = vrot.slane %v2214_v59, 2  ;;  %v1374_v33 = vrot.slane %v1981_v2, 6 }
  0xa3   : > { %v2276_v55 = vsel %vm1115_vm7, %v1118_v39, %v1121_v43  ;;  %v1011_v21 = vor.u32 %v1009_v54, %v2243_v23  ;;  %v2288_v25 = vsel %vm1115_vm7, %v1121_v43, %v1125_v5  ;;  %v1354_v39 = vrot.slane %v2158_v27, 5 }
  0xa4   : > { %1770 = vmatmul.mubr.msk.bf16.gmra.mxu0 %vm420_vm3, %v415_v9  ;;  %v2281_v9 = vsel %vm997_vm6, %v1005_v52, %v1006_v45  ;;  %v1133_v35 = vor.u32 %v1132_v12, %v1131_v7  ;;  %v668_v41 = vor.u32 %v667_v20, %v666_v19  ;;  %v1355_v42 = vrot.slane %v2165_v30, 6 }
  0xa5   : > { %1805 = vmatprep.mubr.msk.bf16.mxu0 %vm1983_vm1, %v1982_v6  ;;  %v1357_v43 = vrot.slane %v2195_v48, 5  ;;  %v539_v44 = vsel %vm513_vm4, %v2207_v56, %v2252_v29  ;;  %v1361_v19 = vrot.slane %v2214_v59, 5  ;;  %v546_v20 = vrot.slane %v2217_v61, 3 }
  0xa6   : > { %v1365_v56 = vrot.slane %v2224_v3, 5  ;;  %v1375_v12 = vor.u32 %v1374_v33, %v2075_v15 }
  0xa8   : > { %1784 = vmatmul.mubr.msk.bf16.vlgmr.msra.gmra.mxu1 %vm420_vm3, %v530_v10  ;;  %v1129_v10 = vor.u32 %v1128_v53, %v1127_v46  ;;  %v1356_v46 = vor.u32 %v1355_v42, %v1354_v39  ;;  %v1362_v53 = vrot.slane %v2217_v61, 6  ;;  %v1367_v7 = vor.u32 %v1366_v14, %v1365_v56 }
  0xa9   : > { %1826 = vmatpush3.bf16.msra.mxu1 %v816_v58  ;;  %1787 = vmatprep.mubr.msk.bf16.mxu1 %vm1983_vm1, %v1982_v6  ;;  %v1008_v58 = vor.u32 %v1006_v45, %v2224_v3  ;;  %v670_v39 = vrot.slane %v2214_v59, 3  ;;  %v671_v42 = vrot.slane %v2217_v61, 4 }
  0xaa   : > { %1869 = vmatprep.subr.bf16.mxu1 %v1982_v6  ;;  %v2297_v34 = vsel %vm1115_vm7, %v1125_v5, %v1129_v10  ;;  %v2311_v45 = vsel %vm1115_vm7, %v1129_v10, %v1133_v35  ;;  %v1369_v5 = vrot.slane %v2243_v23, 5  ;;  %v1370_v10 = vrot.slane %v2246_v24, 6 }
  0xab   : > { %v2291_v26 = vsel %vm997_vm6, %v1008_v58, %v1009_v54  ;;  %v1363_v54 = vor.u32 %v1362_v53, %v1361_v19  ;;  %v669_v58 = vsel %vm658_vm5, %v2209_v57, %v668_v41  ;;  %v674_v53 = vrot.slane %v2224_v3, 3 }
  0xac   : > { %1806 = vmatmul.mubr.msk.bf16.vlgmr.msra.gmra.mxu0 %vm420_vm3, %v665_v11  ;;  %v2300_v11 = vsel %vm997_vm6, %v1011_v21, %v1012_v1  ;;  %v2317_v1 = vsel %vm1115_vm7, %v1133_v35, %v1137_v16  ;;  %v547_v21 = vor.u32 %v546_v20, %v543_v22  ;;  %v555_v22 = vrot.slane %v2227_v4, 3 }
  0xad   : > { %1848 = vmatpush3.bf16.msra.mxu0 %v912_v0  ;;  %1809 = vmatprep.mubr.msk.bf16.mxu0 %vm1983_vm1, %v1982_v6  ;;  %v1358_v0 = vrot.slane %v2198_v51, 6  ;;  %v2344_v57 = vsel %vm1353_vm8, %v1363_v54, %v1367_v7  ;;  %v672_v20 = vor.u32 %v671_v42, %v670_v39  ;;  %v785_v39 = vrot.slane %v2158_v27, 7 }
  0xae   : > { %1891 = vmatprep.subr.bf16.mxu0 %v1982_v6  ;;  %v548_v33 = vsel %vm513_vm4, %v2252_v29, %v547_v21  ;;  %v675_v29 = vrot.slane %v2227_v4, 4 }
  0xaf   : > { %v1359_v52 = vor.u32 %v1358_v0, %v1357_v43  ;;  %v1371_v43 = vor.u32 %v1370_v10, %v1369_v5  ;;  %v552_v0 = vrot.slane %v2224_v3, 2  ;;  %v564_v5 = vrot.slane %v2246_v24, 3 }
  0xb0   : > { %1788 = vmatmul.mubr.msk.bf16.gmra.mxu1 %vm420_vm3, %v539_v44  ;;  %v676_v14 = vor.u32 %v675_v29, %v674_v53  ;;  %v679_v10 = vrot.slane %v2246_v24, 4  ;;  %v794_v29 = vrot.slane %v2224_v3, 7 }
  0xb1   : > { %1791 = vmatprep.mubr.msk.bf16.mxu1 %vm1983_vm1, %v1982_v6  ;;  %v2328_v16 = vsel %vm1353_vm8, %v1356_v46, %v1359_v52  ;;  %v2337_v35 = vsel %vm1353_vm8, %v1359_v52, %v1363_v54  ;;  %v2351_v44 = vsel %vm1353_vm8, %v1367_v7, %v1371_v43  ;;  %v2354_v19 = vsel %vm1353_vm8, %v1371_v43, %v1375_v12 }
  0xb2   : > { %v673_v46 = vsel %vm658_vm5, %v668_v41, %v672_v20  ;;  %v556_v52 = vor.u32 %v555_v22, %v552_v0  ;;  %v561_v54 = vrot.slane %v2243_v23, 2  ;;  %v677_v41 = vsel %vm658_vm5, %v672_v20, %v676_v14 }
  0xb3   : > { %v678_v7 = vrot.slane %v2243_v23, 3  ;;  %v784_v43 = vrot.slane %v1981_v2, 7  ;;  %v786_v0 = vor.u32 %v785_v39, %v2165_v30  ;;  %v399_v2 = vld [vmem:[%s2666_s3 + $0x18] sm:$0xf]  ;;  %v788_v30 = vrot.slane %v2195_v48, 7 }
  0xb4   : > { %1810 = vmatmul.mubr.msk.bf16.gmra.mxu0 %vm420_vm3, %v669_v58  ;;  %v557_v56 = vsel %vm513_vm4, %v547_v21, %v556_v52  ;;  %v565_v58 = vor.u32 %v564_v5, %v561_v54  ;;  %v1155_v20 = vsel %vm436_vm0, %v399_v2, 0 }
  0xb5   : > { %1813 = vmatprep.mubr.msk.bf16.mxu0 %vm1983_vm1, %v1982_v6  ;;  %v680_v21 = vor.u32 %v679_v10, %v678_v7  ;;  %v787_v22 = vsel %vm783_vm9, %v784_v43, %v786_v0 }
  0xb6   : > { %v566_v12 = vsel %vm513_vm4, %v556_v52, %v565_v58  ;;  %v791_v52 = vrot.slane %v2214_v59, 7 }
  0xb7   : > { %v681_v42 = vsel %vm658_vm5, %v676_v14, %v680_v21  ;;  %v401_v14 = vld [vmem:[%s2666_s3 + $0x20] sm:$0xf] }
  0xb8   : > { %1792 = vmatmul.mubr.msk.bf16.gmra.mxu1 %vm420_vm3, %v548_v33  ;;  %v398_v33 = vld [vmem:[%s2666_s3 + $0x14] sm:$0xf]  ;;  %v1393_v54 = vsel %vm436_vm0, %v401_v14, 0 }
  0xb9   : > { %1795 = vmatprep.mubr.msk.bf16.mxu1 %vm1983_vm1, %v1982_v6  ;;  %v1030_v27 = vsel %vm436_vm0, %v398_v33, 0 }
  0xbc   : > { %1814 = vmatmul.mubr.msk.bf16.gmra.mxu0 %vm420_vm3, %v673_v46  ;;  %v789_v46 = vor.u32 %v788_v30, %v2198_v51  ;;  %v792_v51 = vor.u32 %v791_v52, %v2217_v61  ;;  %v797_v61 = vrot.slane %v2243_v23, 7  ;;  %v400_v23 = vld [vmem:[%s2666_s3 + $0x1c] sm:$0xf] }
  0xbd   : > { %1817 = vmatprep.mubr.msk.bf16.mxu0 %vm1983_vm1, %v1982_v6 }
  0xbe   : > { %v790_v48 = vsel %vm783_vm9, %v785_v39, %v789_v46  ;;  %v793_v53 = vsel %vm783_vm9, %v788_v30, %v792_v51  ;;  %v798_v3 = vor.u32 %v797_v61, %v2246_v24  ;;  %v1268_v24 = vsel %vm436_vm0, %v400_v23, 0 }
  0xc0   : > { %1796 = vmatmul.mubr.msk.bf16.gmra.mxu1 %vm420_vm3, %v557_v56  ;;  %v795_v56 = vor.u32 %v794_v29, %v2227_v4  ;;  %v799_v4 = vsel %vm783_vm9, %v794_v29, %v798_v3 }
  0xc1   : > { %1799 = vmatprep.mubr.msk.bf16.mxu1 %vm1983_vm1, %v1982_v6 }
  0xc2   : > { %v796_v59 = vsel %vm783_vm9, %v791_v52, %v795_v56 }
  0xc4   : > { %1818 = vmatmul.mubr.msk.bf16.gmra.mxu0 %vm420_vm3, %v677_v41 }
  0xc5   : > { %1821 = vmatprep.mubr.msk.bf16.mxu0 %vm1983_vm1, %v1982_v6 }
  0xc8   : > { %1800 = vmatmul.mubr.msk.bf16.gmra.mxu1 %vm420_vm3, %v566_v12 }
  0xc9   : > { %1827 = vmatprep.mubr.msk.bf16.mxu1 %vm1983_vm1, %v1982_v6 }
  0xcc   : > { %1822 = vmatmul.mubr.msk.bf16.gmra.mxu0 %vm420_vm3, %v681_v42 }
  0xcd   : > { %1849 = vmatprep.mubr.msk.bf16.mxu0 %vm1983_vm1, %v1982_v6 }
  0xd0   : > { %1828 = vmatmul.mubr.msk.bf16.vlgmr.msra.gmra.mxu1 %vm420_vm3, %v787_v22 }
  0xd1   : > { %1870 = vmatpush3.bf16.msra.mxu1 %v1030_v27  ;;  %1831 = vmatprep.mubr.msk.bf16.mxu1 %vm1983_vm1, %v1982_v6 }
  0xd2   : > { %1913 = vmatprep.subr.bf16.mxu1 %v1982_v6 }
  0xd4   : > { %1850 = vmatmul.mubr.msk.bf16.vlgmr.msra.gmra.mxu0 %vm420_vm3, %v2120_v60 }
  0xd5   : > { %1892 = vmatpush3.bf16.msra.mxu0 %v1155_v20  ;;  %1853 = vmatprep.mubr.msk.bf16.mxu0 %vm1983_vm1, %v1982_v6 }
  0xd6   : > { %1935 = vmatprep.subr.bf16.mxu0 %v1982_v6 }
  0xd8   : > { %1832 = vmatmul.mubr.msk.bf16.gmra.mxu1 %vm420_vm3, %v790_v48 }
  0xd9   : > { %1835 = vmatprep.mubr.msk.bf16.mxu1 %vm1983_vm1, %v1982_v6 }
  0xdc   : > { %1854 = vmatmul.mubr.msk.bf16.gmra.mxu0 %vm420_vm3, %v2160_v28 }
  0xdd   : > { %1857 = vmatprep.mubr.msk.bf16.mxu0 %vm1983_vm1, %v1982_v6 }
  0xe0   : > { %1836 = vmatmul.mubr.msk.bf16.gmra.mxu1 %vm420_vm3, %v793_v53 }
  0xe1   : > { %1839 = vmatprep.mubr.msk.bf16.mxu1 %vm1983_vm1, %v1982_v6 }
  0xe4   : > { %1858 = vmatmul.mubr.msk.bf16.gmra.mxu0 %vm420_vm3, %v2133_v8 }
  0xe5   : > { %1861 = vmatprep.mubr.msk.bf16.mxu0 %vm1983_vm1, %v1982_v6 }
  0xe8   : > { %1840 = vmatmul.mubr.msk.bf16.gmra.mxu1 %vm420_vm3, %v796_v59 }
  0xe9   : > { %1843 = vmatprep.mubr.msk.bf16.mxu1 %vm1983_vm1, %v1982_v6 }
  0xec   : > { %1862 = vmatmul.mubr.msk.bf16.gmra.mxu0 %vm420_vm3, %v2139_v13 }
  0xed   : > { %1865 = vmatprep.mubr.msk.bf16.mxu0 %vm1983_vm1, %v1982_v6 }
  0xf0   : > { %1844 = vmatmul.mubr.msk.bf16.gmra.mxu1 %vm420_vm3, %v799_v4 }
  0xf1   : > { %1871 = vmatprep.mubr.msk.bf16.mxu1 %vm1983_vm1, %v1982_v6 }
  0xf4   : > { %1866 = vmatmul.mubr.msk.bf16.gmra.mxu0 %vm420_vm3, %v2179_v40 }
  0xf5   : > { %1893 = vmatprep.mubr.msk.bf16.mxu0 %vm1983_vm1, %v1982_v6 }
  0xf8   : > { %1872 = vmatmul.mubr.msk.bf16.vlgmr.msra.gmra.mxu1 %vm420_vm3, %v2258_v37  ;;  %v1242_v37 = vrot.slane %v2160_v28, 5  ;;  %v1244_v28 = vrot.slane %v2133_v8, 5 }
  0xf9   : > { %1914 = vmatpush3.bf16.msra.mxu1 %v1268_v24  ;;  %1875 = vmatprep.mubr.msk.bf16.mxu1 %vm1983_vm1, %v1982_v6 }
  0xfc   : > { %1894 = vmatmul.mubr.msk.bf16.vlgmr.msra.gmra.mxu0 %vm420_vm3, %v2276_v55 }
  0xfd   : > { %1936 = vmatpush3.bf16.msra.mxu0 %v1393_v54  ;;  %1897 = vmatprep.mubr.msk.bf16.mxu0 %vm1983_vm1, %v1982_v6 }
 0x100   : > { %1876 = vmatmul.mubr.msk.bf16.gmra.mxu1 %vm420_vm3, %v2269_v47  ;;  %v1241_v47 = vrot.slane %v2120_v60, 5  ;;  %v1245_v60 = vsel %vm1240_vm10, %v1242_v37, %v1244_v28 }
 0x101   : > { %1879 = vmatprep.mubr.msk.bf16.mxu1 %vm1983_vm1, %v1982_v6 }
 0x102   : > { %v1243_v55 = vsel %vm1240_vm10, %v1241_v47, %v1242_v37 }
 0x104   : > { %1898 = vmatmul.mubr.msk.bf16.gmra.mxu0 %vm420_vm3, %v2288_v25  ;;  %v1248_v25 = vrot.slane %v2179_v40, 5 }
 0x105   : > { %1901 = vmatprep.mubr.msk.bf16.mxu0 %vm1983_vm1, %v1982_v6 }
 0x106   : > { %v1251_v40 = vsel %vm1240_vm10, %v1248_v25, %v2075_v15 }
 0x108   : > { %1880 = vmatmul.mubr.msk.bf16.gmra.mxu1 %vm420_vm3, %v2281_v9  ;;  %v1246_v9 = vrot.slane %v2139_v13, 5 }
 0x109   : > { %1883 = vmatprep.mubr.msk.bf16.mxu1 %vm1983_vm1, %v1982_v6 }
 0x10a   : > { %v1247_v8 = vsel %vm1240_vm10, %v1244_v28, %v1246_v9  ;;  %v1249_v13 = vsel %vm1240_vm10, %v1246_v9, %v1248_v25 }
 0x10c   : > { %1902 = vmatmul.mubr.msk.bf16.gmra.mxu0 %vm420_vm3, %v2297_v34 }
 0x10d   : > { %1905 = vmatprep.mubr.msk.bf16.mxu0 %vm1983_vm1, %v1982_v6 }
 0x110   : > { %1884 = vmatmul.mubr.msk.bf16.gmra.mxu1 %vm420_vm3, %v2291_v26 }
 0x111   : > { %1887 = vmatprep.mubr.msk.bf16.mxu1 %vm1983_vm1, %v1982_v6 }
 0x114   : > { %1906 = vmatmul.mubr.msk.bf16.gmra.mxu0 %vm420_vm3, %v2311_v45 }
 0x115   : > { %1909 = vmatprep.mubr.msk.bf16.mxu0 %vm1983_vm1, %v1982_v6 }
 0x118   : > { %1888 = vmatmul.mubr.msk.bf16.gmra.mxu1 %vm420_vm3, %v2300_v11 }
 0x119   : > { %1915 = vmatprep.mubr.msk.bf16.mxu1 %vm1983_vm1, %v1982_v6 }
 0x11c   : > { %1910 = vmatmul.mubr.msk.bf16.gmra.mxu0 %vm420_vm3, %v2317_v1 }
 0x11d   : > { %1937 = vmatprep.mubr.msk.bf16.mxu0 %vm1983_vm1, %v1982_v6 }
 0x120   : > { %1916 = vmatmul.mubr.msk.bf16.vlgmr.msra.gmra.mxu1 %vm420_vm3, %v1243_v55 }
 0x121   : > { %1919 = vmatprep.mubr.msk.bf16.mxu1 %vm1983_vm1, %v1982_v6 }
 0x124   : > { %1938 = vmatmul.mubr.msk.bf16.vlgmr.msra.gmra.mxu0 %vm420_vm3, %v2328_v16 }
 0x125   : > { %1941 = vmatprep.mubr.msk.bf16.mxu0 %vm1983_vm1, %v1982_v6 }
 0x128   : > { %1920 = vmatmul.mubr.msk.bf16.gmra.mxu1 %vm420_vm3, %v1245_v60 }
 0x129   : > { %1923 = vmatprep.mubr.msk.bf16.mxu1 %vm1983_vm1, %v1982_v6 }
 0x12c   : > { %1942 = vmatmul.mubr.msk.bf16.gmra.mxu0 %vm420_vm3, %v2337_v35 }
 0x12d   : > { %1945 = vmatprep.mubr.msk.bf16.mxu0 %vm1983_vm1, %v1982_v6 }
 0x130   : > { %1924 = vmatmul.mubr.msk.bf16.gmra.mxu1 %vm420_vm3, %v1247_v8 }
 0x131   : > { %1927 = vmatprep.mubr.msk.bf16.mxu1 %vm1983_vm1, %v1982_v6 }
 0x134   : > { %1946 = vmatmul.mubr.msk.bf16.gmra.mxu0 %vm420_vm3, %v2344_v57 }
 0x135   : > { %1949 = vmatprep.mubr.msk.bf16.mxu0 %vm1983_vm1, %v1982_v6 }
 0x138   : > { %1928 = vmatmul.mubr.msk.bf16.gmra.mxu1 %vm420_vm3, %v1249_v13 }
 0x139   : > { %1931 = vmatprep.mubr.msk.bf16.mxu1 %vm1983_vm1, %v1982_v6 }
 0x13c   : > { %1950 = vmatmul.mubr.msk.bf16.gmra.mxu0 %vm420_vm3, %v2351_v44 }
 0x13d   : > { %1953 = vmatprep.mubr.msk.bf16.mxu0 %vm1983_vm1, %v1982_v6 }
 0x140   : > { %1932 = vmatmul.mubr.msk.bf16.gmra.mxu1 %vm420_vm3, %v1251_v40 }
 0x144   : > { %1954 = vmatmul.mubr.msk.bf16.gmra.mxu0 %vm420_vm3, %v2354_v19 }
 0x154   : > { %v474_v26 = vpop.f32.mrf.mxu0 }
 0x156   : > { %v1763_v34 = vpop.f32.mrf.mxu0 }
 0x158   : > { %v477_v11 = vpop.f32.mrf.mxu0  ;;  %v498_v45 = vpop.f32.mrf.mxu1 }
 0x15a   : > { %v1764_v1 = vpop.f32.mrf.mxu0  ;;  %v1775_v16 = vpop.f32.mrf.mxu1 }
 0x15c   : > { %v482_v35 = vpop.f32.mrf.mxu0  ;;  %v501_v57 = vpop.f32.mrf.mxu1 }
 0x15e   : > { %v1767_v44 = vpop.f32.mrf.mxu0  ;;  %v1776_v5 = vpop.f32.mrf.mxu1 }
 0x160   : > { %v485_v41 = vpop.f32.mrf.mxu0  ;;  %v506_v6 = vpop.f32.mrf.mxu1 }
 0x162   : > { %v1768_v58 = vpop.f32.mrf.mxu0  ;;  %v1779_v7 = vpop.f32.mrf.mxu1 }
 0x164   : > { %v490_v15 = vpop.f32.mrf.mxu0  ;;  %v509_v10 = vpop.f32.mrf.mxu1 }
 0x166   : > { %v1771_v12 = vpop.f32.mrf.mxu0  ;;  %v1780_v21 = vpop.f32.mrf.mxu1 }
 0x168   : > { %v493_v39 = vpop.f32.mrf.mxu0  ;;  %v619_v19 = vpop.f32.mrf.mxu1 }
 0x169   : > { %v620_v42 = vadd.f32 %v619_v19, %v474_v26 }
 0x16a   : > { %v1772_v43 = vpop.f32.mrf.mxu0  ;;  %v1785_v0 = vpop.f32.mrf.mxu1 }
 0x16c   : > { %v622_v33 = vpop.f32.mrf.mxu1  ;;  %v734_v27 = vpop.f32.mrf.mxu0 }
 0x16d   : > { %v623_v22 = vadd.f32 %v622_v33, %v477_v11  ;;  %v773_v2 = vadd.f32 %v734_v27, %v620_v42 }
 0x16e   : > { %v1786_v30 = vpop.f32.mrf.mxu1  ;;  %v1807_v20 = vpop.f32.mrf.mxu0 }
 0x170   : > { %v627_v46 = vpop.f32.mrf.mxu1  ;;  %v737_v48 = vpop.f32.mrf.mxu0 }
 0x171   : > { %v628_v52 = vadd.f32 %v627_v46, %v482_v35  ;;  %v774_v51 = vadd.f32 %v737_v48, %v623_v22 }
 0x172   : > { %v1789_v53 = vpop.f32.mrf.mxu1  ;;  %v1808_v29 = vpop.f32.mrf.mxu0 }
 0x174   : > { %v630_v56 = vpop.f32.mrf.mxu1  ;;  %v742_v59 = vpop.f32.mrf.mxu0 }
 0x175   : > { %v631_v61 = vadd.f32 %v630_v56, %v485_v41  ;;  %v775_v3 = vadd.f32 %v742_v59, %v628_v52 }
 0x176   : > { %v1790_v4 = vpop.f32.mrf.mxu1  ;;  %v1811_v23 = vpop.f32.mrf.mxu0 }
 0x178   : > { %v635_v24 = vpop.f32.mrf.mxu1  ;;  %v745_v14 = vpop.f32.mrf.mxu0 }
 0x179   : > { %v636_v54 = vadd.f32 %v635_v24, %v490_v15  ;;  %v776_v37 = vadd.f32 %v745_v14, %v631_v61 }
 0x17a   : > { %v1793_v47 = vpop.f32.mrf.mxu1  ;;  %v1812_v55 = vpop.f32.mrf.mxu0 }
 0x17c   : > { %v638_v28 = vpop.f32.mrf.mxu1  ;;  %v750_v60 = vpop.f32.mrf.mxu0 }
 0x17d   : > { %v639_v9 = vadd.f32 %v638_v28, %v493_v39  ;;  %v777_v8 = vadd.f32 %v750_v60, %v636_v54 }
 0x17e   : > { %v1794_v25 = vpop.f32.mrf.mxu1  ;;  %v1815_v13 = vpop.f32.mrf.mxu0 }
 0x180   : > { %v643_v40 = vpop.f32.mrf.mxu1  ;;  %v753_v26 = vpop.f32.mrf.mxu0 }
 0x181   : > { %v644_v34 = vadd.f32 %v643_v40, %v498_v45  ;;  %v778_v11 = vadd.f32 %v753_v26, %v639_v9 }
 0x182   : > { %v1797_v1 = vpop.f32.mrf.mxu1  ;;  %v1816_v16 = vpop.f32.mrf.mxu0 }
 0x184   : > { %v646_v35 = vpop.f32.mrf.mxu1  ;;  %v758_v44 = vpop.f32.mrf.mxu0 }
 0x185   : > { %v647_v5 = vadd.f32 %v646_v35, %v501_v57  ;;  %v779_v41 = vadd.f32 %v758_v44, %v644_v34 }
 0x186   : > { %v1798_v58 = vpop.f32.mrf.mxu1  ;;  %v1819_v7 = vpop.f32.mrf.mxu0 }
 0x188   : > { %v651_v15 = vpop.f32.mrf.mxu1  ;;  %v761_v12 = vpop.f32.mrf.mxu0 }
 0x189   : > { %v652_v21 = vadd.f32 %v651_v15, %v506_v6  ;;  %v780_v19 = vadd.f32 %v761_v12, %v647_v5 }
 0x18a   : > { %v1801_v39 = vpop.f32.mrf.mxu1  ;;  %v1820_v42 = vpop.f32.mrf.mxu0 }
 0x18c   : > { %v654_v43 = vpop.f32.mrf.mxu1  ;;  %v766_v0 = vpop.f32.mrf.mxu0 }
 0x18d   : > { %v655_v33 = vadd.f32 %v654_v43, %v509_v10  ;;  %v781_v27 = vadd.f32 %v766_v0, %v652_v21 }
 0x18e   : > { %v1802_v45 = vpop.f32.mrf.mxu1  ;;  %v1823_v22 = vpop.f32.mrf.mxu0 }
 0x190   : > { %v769_v30 = vpop.f32.mrf.mxu0  ;;  %v852_v20 = vpop.f32.mrf.mxu1 }
 0x191   : > { %v782_v46 = vadd.f32 %v769_v30, %v655_v33  ;;  %v891_v48 = vadd.f32 %v852_v20, %v773_v2 }
 0x192   : > { %v1824_v57 = vpop.f32.mrf.mxu0  ;;  %v1829_v52 = vpop.f32.mrf.mxu1 }
 0x194   : > { %v855_v53 = vpop.f32.mrf.mxu1  ;;  %v948_v29 = vpop.f32.mrf.mxu0 }
 0x195   : > { %v892_v56 = vadd.f32 %v855_v53, %v774_v51  ;;  %v2536_v59 = vadd.f32 %v948_v29, %v891_v48 }
 0x196   : > { %v1830_v6 = vpop.f32.mrf.mxu1  ;;  %v1851_v61 = vpop.f32.mrf.mxu0 }
 0x198   : > { %v860_v4 = vpop.f32.mrf.mxu1  ;;  %v951_v23 = vpop.f32.mrf.mxu0 }
 0x199   : > { %v893_v24 = vadd.f32 %v860_v4, %v775_v3  ;;  %v2538_v10 = vadd.f32 %v951_v23, %v892_v56 }
 0x19a   : > { %v1833_v14 = vpop.f32.mrf.mxu1  ;;  %v1852_v54 = vpop.f32.mrf.mxu0 }
 0x19c   : > { %v863_v47 = vpop.f32.mrf.mxu1  ;;  %v956_v55 = vpop.f32.mrf.mxu0 }
 0x19d   : > { %v894_v28 = vadd.f32 %v863_v47, %v776_v37  ;;  %v2540_v2 = vadd.f32 %v956_v55, %v893_v24 }
 0x19e   : > { %v1834_v60 = vpop.f32.mrf.mxu1  ;;  %v1855_v9 = vpop.f32.mrf.mxu0 }
 0x1a0   : > { %v868_v25 = vpop.f32.mrf.mxu1  ;;  %v959_v51 = vpop.f32.mrf.mxu0 }
 0x1a1   : > { %v895_v13 = vadd.f32 %v868_v25, %v777_v8  ;;  %v2542_v40 = vadd.f32 %v959_v51, %v894_v28 }
 0x1a2   : > { %v1837_v26 = vpop.f32.mrf.mxu1  ;;  %v1856_v34 = vpop.f32.mrf.mxu0 }
 0x1a4   : > { %v871_v1 = vpop.f32.mrf.mxu1  ;;  %v964_v3 = vpop.f32.mrf.mxu0 }
 0x1a5   : > { %v896_v16 = vadd.f32 %v871_v1, %v778_v11  ;;  %v2544_v35 = vadd.f32 %v964_v3, %v895_v13 }
 0x1a6   : > { %v1838_v44 = vpop.f32.mrf.mxu1  ;;  %v1859_v5 = vpop.f32.mrf.mxu0 }
 0x1a8   : > { %v876_v58 = vpop.f32.mrf.mxu1  ;;  %v967_v37 = vpop.f32.mrf.mxu0 }
 0x1a9   : > { %v897_v7 = vadd.f32 %v876_v58, %v779_v41  ;;  %v2546_v15 = vadd.f32 %v967_v37, %v896_v16 }
 0x1aa   : > { %v1841_v12 = vpop.f32.mrf.mxu1  ;;  %v1860_v21 = vpop.f32.mrf.mxu0 }
 0x1ac   : > { %v879_v39 = vpop.f32.mrf.mxu1  ;;  %v972_v8 = vpop.f32.mrf.mxu0 }
 0x1ad   : > { %v898_v42 = vadd.f32 %v879_v39, %v780_v19  ;;  %v2548_v43 = vadd.f32 %v972_v8, %v897_v7 }
 0x1ae   : > { %v1842_v0 = vpop.f32.mrf.mxu1  ;;  %v1863_v33 = vpop.f32.mrf.mxu0 }
 0x1b0   : > { %v884_v45 = vpop.f32.mrf.mxu1  ;;  %v975_v11 = vpop.f32.mrf.mxu0 }
 0x1b1   : > { %v899_v22 = vadd.f32 %v884_v45, %v781_v27  ;;  %v2550_v30 = vadd.f32 %v975_v11, %v898_v42 }
 0x1b2   : > { %v1845_v20 = vpop.f32.mrf.mxu1  ;;  %v1864_v48 = vpop.f32.mrf.mxu0 }
 0x1b4   : > { %v887_v57 = vpop.f32.mrf.mxu1  ;;  %v980_v41 = vpop.f32.mrf.mxu0 }
 0x1b5   : > { %v900_v52 = vadd.f32 %v887_v57, %v782_v46  ;;  %v2552_v53 = vadd.f32 %v980_v41, %v899_v22 }
 0x1b6   : > { %v1846_v29 = vpop.f32.mrf.mxu1  ;;  %v1867_v56 = vpop.f32.mrf.mxu0 }
 0x1b8   : > { %v983_v6 = vpop.f32.mrf.mxu0  ;;  %v1066_v19 = vpop.f32.mrf.mxu1 }
 0x1b9   : > { %v2554_v61 = vadd.f32 %v983_v6, %v900_v52  ;;  %v1105_v41 = vadd.f32 %v1066_v19, %v2536_v59 }
 0x1ba   : > { %v1868_v4 = vpop.f32.mrf.mxu0  ;;  %v1873_v23 = vpop.f32.mrf.mxu1 }
 0x1bc   : > { %v1069_v24 = vpop.f32.mrf.mxu1  ;;  %v1191_v14 = vpop.f32.mrf.mxu0 }
 0x1bd   : > { %v1230_v56 = vadd.f32 %v1191_v14, %v1105_v41  ;;  %v1106_v23 = vadd.f32 %v1069_v24, %v2538_v10 }
 0x1be   : > { %v1874_v27 = vpop.f32.mrf.mxu1  ;;  %v1895_v54 = vpop.f32.mrf.mxu0 }
 0x1c0   : > { %v1074_v47 = vpop.f32.mrf.mxu1  ;;  %v1194_v55 = vpop.f32.mrf.mxu0 }
 0x1c1   : > { %v1107_v14 = vadd.f32 %v1074_v47, %v2540_v2 }
 0x1c2   : > { %v1877_v28 = vpop.f32.mrf.mxu1  ;;  %v1896_v60 = vpop.f32.mrf.mxu0 }
 0x1c3   : > { %v1231_v60 = vadd.f32 %v1194_v55, %v1106_v23 }
 0x1c4   : > { %v1077_v9 = vpop.f32.mrf.mxu1  ;;  %v1199_v46 = vpop.f32.mrf.mxu0 }
 0x1c6   : > { %v1878_v25 = vpop.f32.mrf.mxu1  ;;  %v1899_v51 = vpop.f32.mrf.mxu0 }
 0x1c8   : > { %v1082_v13 = vpop.f32.mrf.mxu1  ;;  %v1202_v26 = vpop.f32.mrf.mxu0 }
 0x1ca   : > { %v1881_v34 = vpop.f32.mrf.mxu1  ;;  %v1900_v1 = vpop.f32.mrf.mxu0 }
 0x1cb   : > { %v1232_v1 = vadd.f32 %v1199_v46, %v1107_v14 }
 0x1cc   : > { %v2556_v3 = vpop.f32.mrf.mxu1  ;;  %v2558_v16 = vpop.f32.mrf.mxu0 }
 0x1ce   : > { %v1882_v44 = vpop.f32.mrf.mxu1  ;;  %v1903_v5 = vpop.f32.mrf.mxu0 }
 0x1cf   : > { %v1108_v5 = vadd.f32 %v1077_v9, %v2542_v40  ;;  %v1109_v40 = vadd.f32 %v1082_v13, %v2544_v35 }
 0x1d0   : > { %v2560_v58 = vpop.f32.mrf.mxu1  ;;  %v2562_v37 = vpop.f32.mrf.mxu0 }
 0x1d1   : > { %v1233_v47 = vadd.f32 %v1202_v26, %v1108_v5 }
 0x1d2   : > { %v1885_v7 = vpop.f32.mrf.mxu1  ;;  %v1904_v12 = vpop.f32.mrf.mxu0 }
 0x1d4   : > { %v2564_v21 = vpop.f32.mrf.mxu1  ;;  %v2566_v39 = vpop.f32.mrf.mxu0 }
 0x1d6   : > { %v1886_v8 = vpop.f32.mrf.mxu1  ;;  %v1907_v42 = vpop.f32.mrf.mxu0 }
 0x1d8   : > { %v2568_v0 = vpop.f32.mrf.mxu1  ;;  %v2570_v33 = vpop.f32.mrf.mxu0 }
 0x1da   : > { %v1889_v45 = vpop.f32.mrf.mxu1  ;;  %v1908_v11 = vpop.f32.mrf.mxu0 }
 0x1dc   : > { %v2572_v22 = vpop.f32.mrf.mxu1  ;;  %v2574_v20 = vpop.f32.mrf.mxu0 }
 0x1de   : > { %v1890_v48 = vpop.f32.mrf.mxu1  ;;  %v1911_v57 = vpop.f32.mrf.mxu0 }
 0x1e0   : > { %v2577_v52 = vpop.f32.mrf.mxu0  ;;  %v1304_v29 = vpop.f32.mrf.mxu1 }
 0x1e1   : > { %v1343_v27 = vadd.f32 %v1304_v29, %v1230_v56 }
 0x1e2   : > { %v1912_v6 = vpop.f32.mrf.mxu0  ;;  %v1917_v4 = vpop.f32.mrf.mxu1 }
 0x1e4   : > { %v1307_v54 = vpop.f32.mrf.mxu1  ;;  %v1429_v28 = vpop.f32.mrf.mxu0 }
 0x1e5   : > { %v1468_v59 = vadd.f32 %v1429_v28, %v1343_v27  ;;  %v1344_v51 = vadd.f32 %v1307_v54, %v1231_v60  ;;  %v1234_v27 = vadd.f32 %v2558_v16, %v1109_v40 }
 0x1e6   : > { %v1918_v19 = vpop.f32.mrf.mxu1  ;;  %v1939_v25 = vpop.f32.mrf.mxu0 }
 0x1e7   : > { %1478 = vst.msk [vmem:[%s2585_s28] sm:$0xff] %vm420_vm3, %v1468_v59  ;;  %v1488_v10 = vmul.f32 %v1468_v59, %v2109_v38  ;;  %v1110_v19 = vadd.f32 %v2556_v3, %v2546_v15  ;;  %v1111_v3 = vadd.f32 %v2560_v58, %v2548_v43  ;;  %v1112_v58 = vadd.f32 %v2564_v21, %v2550_v30 }
 0x1e8   : > { %v1312_v24 = vpop.f32.mrf.mxu1  ;;  %v1432_v34 = vpop.f32.mrf.mxu0  ;;  %v1113_v21 = vadd.f32 %v2568_v0, %v2552_v53  ;;  %v1114_v0 = vadd.f32 %v2572_v22, %v2554_v61 }
 0x1e9   : > { %v1469_v44 = vadd.f32 %v1432_v34, %v1344_v51  ;;  %v1523_v55 = vmul.f32 %v1488_v10, %v1468_v59  ;;  %v1345_v8 = vadd.f32 %v1312_v24, %v1232_v1  ;;  %v1498_v38 = vsel %vm420_vm3, %v1488_v10, 0.0 }
 0x1ea   : > { %v1921_v7 = vpop.f32.mrf.mxu1  ;;  %v1940_v12 = vpop.f32.mrf.mxu0  ;;  %v1235_v24 = vadd.f32 %v2562_v37, %v1110_v19 }
 0x1eb   : > { %1479 = vst.msk [vmem:[%s2585_s28 + $0x8] sm:$0xff] %vm420_vm3, %v1469_v44  ;;  %v1489_v2 = vmul.f32 %v1469_v44, %v2115_v50  ;;  %v1533_v29 = vsel %vm420_vm3, %v1523_v55, 0.0 }
 0x1ec   : > { %v1315_v42 = vpop.f32.mrf.mxu1  ;;  %v1437_v45 = vpop.f32.mrf.mxu0 }
 0x1ed   : > { %v1499_v11 = vsel %vm420_vm3, %v1489_v2, 0.0  ;;  %v1524_v46 = vmul.f32 %v1489_v2, %v1469_v44  ;;  %v1470_v48 = vadd.f32 %v1437_v45, %v1345_v8  ;;  %v1346_v6 = vadd.f32 %v1315_v42, %v1233_v47 }
 0x1ee   : > { %v1500_v9 = vadd.f32 %v1499_v11, %v1498_v38  ;;  %v1922_v57 = vpop.f32.mrf.mxu1  ;;  %v1943_v41 = vpop.f32.mrf.mxu0  ;;  %v1236_v47 = vadd.f32 %v2566_v39, %v1111_v3 }
 0x1ef   : > { %v1534_v56 = vsel %vm420_vm3, %v1524_v46, 0.0  ;;  %1480 = vst.msk [vmem:[%s2585_s28 + $0x10] sm:$0xff] %vm420_vm3, %v1470_v48  ;;  %v1490_v50 = vmul.f32 %v1470_v48, %v2143_v18  ;;  %v1237_v41 = vadd.f32 %v2570_v33, %v1112_v58 }
 0x1f0   : > { %v1535_v26 = vadd.f32 %v1534_v56, %v1533_v29  ;;  %v1320_v4 = vpop.f32.mrf.mxu1  ;;  %v1440_v23 = vpop.f32.mrf.mxu0 }
 0x1f1   : > { %v1501_v35 = vsel %vm420_vm3, %v1490_v50, 0.0  ;;  %v1525_v13 = vmul.f32 %v1490_v50, %v1470_v48  ;;  %v1471_v54 = vadd.f32 %v1440_v23, %v1346_v6  ;;  %v1347_v14 = vadd.f32 %v1320_v4, %v1234_v27 }
 0x1f2   : > { %v1502_v28 = vadd.f32 %v1501_v35, %v1500_v9  ;;  %v1925_v60 = vpop.f32.mrf.mxu1  ;;  %v1944_v59 = vpop.f32.mrf.mxu0 }
 0x1f3   : > { %v1536_v25 = vsel %vm420_vm3, %v1525_v13, 0.0  ;;  %1481 = vst.msk [vmem:[%s2585_s28 + $0x18] sm:$0xff] %vm420_vm3, %v1471_v54  ;;  %v1491_v18 = vmul.f32 %v1471_v54, %v2141_v17  ;;  %v1238_v13 = vadd.f32 %v2574_v20, %v1113_v21 }
 0x1f4   : > { %v1537_v51 = vadd.f32 %v1536_v25, %v1535_v26  ;;  %v1323_v16 = vpop.f32.mrf.mxu1  ;;  %v1445_v10 = vpop.f32.mrf.mxu0 }
 0x1f5   : > { %v1503_v34 = vsel %vm420_vm3, %v1491_v18, 0.0  ;;  %v1526_v1 = vmul.f32 %v1491_v18, %v1471_v54  ;;  %v1472_v44 = vadd.f32 %v1445_v10, %v1347_v14  ;;  %v1348_v55 = vadd.f32 %v1323_v16, %v1235_v24 }
 0x1f6   : > { %v1504_v5 = vadd.f32 %v1503_v34, %v1502_v28  ;;  %v1926_v7 = vpop.f32.mrf.mxu1  ;;  %v1947_v15 = vpop.f32.mrf.mxu0  ;;  %v1239_v16 = vadd.f32 %v2577_v52, %v1114_v0 }
 0x1f7   : > { %v1538_v12 = vsel %vm420_vm3, %v1526_v1, 0.0  ;;  %1482 = vst.msk [vmem:[%s2585_s28 + $0x20] sm:$0xff] %vm420_vm3, %v1472_v44  ;;  %v1492_v17 = vmul.f32 %v1472_v44, %v2107_v36 }
 0x1f8   : > { %v1539_v8 = vadd.f32 %v1538_v12, %v1537_v51  ;;  %v1328_v37 = vpop.f32.mrf.mxu1  ;;  %v1448_v2 = vpop.f32.mrf.mxu0 }
 0x1f9   : > { %v1505_v42 = vsel %vm420_vm3, %v1492_v17, 0.0  ;;  %v1527_v45 = vmul.f32 %v1492_v17, %v1472_v44  ;;  %v1473_v38 = vadd.f32 %v1448_v2, %v1348_v55  ;;  %v1349_v40 = vadd.f32 %v1328_v37, %v1236_v47 }
 0x1fa   : > { %v1506_v11 = vadd.f32 %v1505_v42, %v1504_v5  ;;  %v1929_v46 = vpop.f32.mrf.mxu1  ;;  %v1948_v43 = vpop.f32.mrf.mxu0 }
 0x1fb   : > { %v1540_v48 = vsel %vm420_vm3, %v1527_v45, 0.0  ;;  %1483 = vst.msk [vmem:[%s2585_s28 + $0x28] sm:$0xff] %vm420_vm3, %v1473_v38  ;;  %v1493_v36 = vmul.f32 %v1473_v38, %v2113_v49 }
 0x1fc   : > { %v1541_v9 = vadd.f32 %v1540_v48, %v1539_v8  ;;  %v1331_v39 = vpop.f32.mrf.mxu1  ;;  %v1453_v57 = vpop.f32.mrf.mxu0 }
 0x1fd   : > { %v1507_v29 = vsel %vm420_vm3, %v1493_v36, 0.0  ;;  %v1528_v56 = vmul.f32 %v1493_v36, %v1473_v38  ;;  %v1474_v6 = vadd.f32 %v1453_v57, %v1349_v40  ;;  %v1350_v23 = vadd.f32 %v1331_v39, %v1237_v41 }
 0x1fe   : > { %v1508_v50 = vadd.f32 %v1507_v29, %v1506_v11  ;;  %v1930_v26 = vpop.f32.mrf.mxu1  ;;  %v1951_v30 = vpop.f32.mrf.mxu0 }
 0x1ff   : > { %v1542_v4 = vsel %vm420_vm3, %v1528_v56, 0.0  ;;  %1484 = vst.msk [vmem:[%s2585_s28 + $0x30] sm:$0xff] %vm420_vm3, %v1474_v6  ;;  %v1494_v49 = vmul.f32 %v1474_v6, %v2125_v63 }
 0x200   : > { %v1543_v27 = vadd.f32 %v1542_v4, %v1541_v9  ;;  %v1336_v33 = vpop.f32.mrf.mxu1  ;;  %v1456_v35 = vpop.f32.mrf.mxu0 }
 0x201   : > { %v1509_v54 = vsel %vm420_vm3, %v1494_v49, 0.0  ;;  %v1529_v28 = vmul.f32 %v1494_v49, %v1474_v6  ;;  %v1475_v60 = vadd.f32 %v1456_v35, %v1350_v23  ;;  %v1351_v14 = vadd.f32 %v1336_v33, %v1238_v13 }
 0x202   : > { %v1510_v59 = vadd.f32 %v1509_v54, %v1508_v50  ;;  %v1933_v19 = vpop.f32.mrf.mxu1  ;;  %v1952_v53 = vpop.f32.mrf.mxu0 }
 0x203   : > { %v1544_v25 = vsel %vm420_vm3, %v1529_v28, 0.0  ;;  %1485 = vst.msk [vmem:[%s2585_s28 + $0x38] sm:$0xff] %vm420_vm3, %v1475_v60  ;;  %v1495_v63 = vmul.f32 %v1475_v60, %v2123_v62 }
 0x204   : > { %v1545_v18 = vadd.f32 %v1544_v25, %v1543_v27  ;;  %v1339_v20 = vpop.f32.mrf.mxu1  ;;  %v1461_v51 = vpop.f32.mrf.mxu0 }
 0x205   : > { %v1511_v10 = vsel %vm420_vm3, %v1495_v63, 0.0  ;;  %v1530_v24 = vmul.f32 %v1495_v63, %v1475_v60  ;;  %v1476_v34 = vadd.f32 %v1461_v51, %v1351_v14  ;;  %v1352_v5 = vadd.f32 %v1339_v20, %v1239_v16 }
 0x206   : > { %v1512_v1 = vadd.f32 %v1511_v10, %v1510_v59  ;;  %v1934_v61 = vpop.f32.mrf.mxu1  ;;  %v1955_v22 = vpop.f32.mrf.mxu0 }
 0x207   : > { %v1546_v44 = vsel %vm420_vm3, %v1530_v24, 0.0  ;;  %1486 = vst.msk [vmem:[%s2585_s28 + $0x40] sm:$0xff] %vm420_vm3, %v1476_v34  ;;  %v1496_v62 = vmul.f32 %v1476_v34, %v2169_v32 }
 0x208   : > { %v1547_v7 = vadd.f32 %v1546_v44, %v1545_v18  ;;  %v1464_v15 = vpop.f32.mrf.mxu0 }
 0x209   : > { %v1513_v3 = vsel %vm420_vm3, %v1496_v62, 0.0  ;;  %v1531_v52 = vmul.f32 %v1496_v62, %v1476_v34  ;;  %v1477_v12 = vadd.f32 %v1464_v15, %v1352_v5 }
 0x20a   : > { %v1514_v55 = vadd.f32 %v1513_v3, %v1512_v1  ;;  %v1956_v17 = vpop.f32.mrf.mxu0 }
 0x20b   : > { %v1548_v8 = vsel %vm420_vm3, %v1531_v52, 0.0  ;;  %1487 = vst.msk [vmem:[%s2585_s28 + $0x48] sm:$0xff] %vm420_vm3, %v1477_v12  ;;  %v1497_v37 = vmul.f32 %v1477_v12, %v2167_v31 }
 0x20c   : > { %v1549_v2 = vadd.f32 %v1548_v8, %v1547_v7 }
 0x20d   : > { %v1515_v47 = vsel %vm420_vm3, %v1497_v37, 0.0  ;;  %v1532_v42 = vmul.f32 %v1497_v37, %v1477_v12 }
 0x20e   : > { %v1516_v32 = vadd.f32 %v1515_v47, %v1514_v55 }
 0x20f   : > { %v1550_v45 = vsel %vm420_vm3, %v1532_v42, 0.0 }
 0x210   : > { %v1517_v38 = vrot.slane %v1516_v32, 4  ;;  %v1551_v11 = vadd.f32 %v1550_v45, %v1549_v2 }
 0x212   : > { %v1518_v46 = vadd.f32 %v1517_v38, %v1516_v32  ;;  %v1552_v43 = vrot.slane %v1551_v11, 4 }
 0x214   : > { %v1519_v58 = vrot.slane %v1518_v46, 2  ;;  %v1553_v48 = vadd.f32 %v1552_v43, %v1551_v11 }
 0x216   : > { %v1520_v40 = vadd.f32 %v1519_v58, %v1518_v46  ;;  %v1554_v36 = vrot.slane %v1553_v48, 2 }
 0x218   : > { %v1521_v9 = vrot.slane %v1520_v40, 1  ;;  %v1555_v39 = vadd.f32 %v1554_v36, %v1553_v48 }
 0x21a   : > { %v1556_v31 = vrot.slane %v1555_v39, 1  ;;  %v1522_v57 = vadd.f32 %v1521_v9, %v1520_v40 }
 0x21c   : > { %v1557_v41 = vadd.f32 %v1556_v31, %v1555_v39 }
 0x21e   : > { %v1559_v29 = vsel %vm1558_vm11, %v1522_v57, %v1557_v41 }
 0x21f   : > { %1561 = vst.msk [vmem:[%s262_s7] sm:$0x3] %vm1560_vm12, %v1559_v29 }
 0x220 PF: > { %s17_s21 = sadd.s32 1, %s1979_s21  }
 0x221   : > { %p14_p4 = scmp.ge.s32.totalorder %s17_s21, 4  }
 0x223   :  { %16 = sbr.rel (!%p14_p4) target bundleno = 1 (0x1), region = 82 }

</bundles_post_ra>
